<compile_context>
chip_gen: v6e
topology: v6e:2x2x1
jax: 0.10.0
libtpu: 0.0.40
codegen_flags: <defaults>
</compile_context>

<pallas_src>
import functools
import math

import jax
import jax.numpy as jnp
from jax.experimental import pallas as pl
from jax.experimental.pallas import tpu as pltpu


# -----------------------------------------------------------------------------
# Kernel
# -----------------------------------------------------------------------------
def rainbow_head_kernel(x_ref, w1_ref, b1_ref, w2_ref, b2_ref,
                        logit_ref, dist_ref, *,
                        output_size, n_atom, atom_pad, v_min, v_max, eps):
    f32 = jnp.float32
    M = output_size

    x = x_ref[...]                                                    # (TB, H)

    # --- fused first layer [A | Q]: Linear -> ReLU (one MXU pass) -------------
    h = jnp.dot(x, w1_ref[...], preferred_element_type=f32) + b1_ref[...]
    h = jnp.maximum(h, 0.0)                                           # (TB, 2H)

    # --- fused block-diagonal second layer (one MXU pass) ---------------------
    # columns [m*atom_pad, m*atom_pad + n_atom): advantage atoms of action m (m < M)
    # columns [M*atom_pad, M*atom_pad + n_atom): state-value atoms (Q branch)
    y = jnp.dot(h.astype(w2_ref.dtype), w2_ref[...],
                preferred_element_type=f32) + b2_ref[...]             # (TB, (M+1)*atom_pad)

    tb = x.shape[0]
    lane = jax.lax.broadcasted_iota(jnp.int32, (tb, atom_pad), 1)
    valid = lane < n_atom                                             # mask of real atoms
    z = jnp.where(valid,
                  v_min + lane.astype(f32) * ((v_max - v_min) / (n_atom - 1)),
                  0.0)                                                # atom support values
    neg_big = f32(-1e30)

    # --- dueling combine: per-atom mean over actions ---------------------------
    amean = y[:, 0:atom_pad]
    for m in range(1, M):                                             # static, aligned slices
        amean = amean + y[:, m * atom_pad:(m + 1) * atom_pad]
    q_state = y[:, M * atom_pad:(M + 1) * atom_pad]
    shift = q_state - amean * (1.0 / M)                               # (TB, atom_pad)

    # --- per-action masked softmax over atoms + expected value -----------------
    for m in range(M):
        cm = y[:, m * atom_pad:(m + 1) * atom_pad] + shift
        cm = jnp.where(valid, cm, neg_big)
        cmax = jnp.max(cm, axis=-1, keepdims=True)
        e = jnp.exp(cm - cmax)                                        # padding lanes -> 0
        s = jnp.sum(e, axis=-1, keepdims=True)
        dist_m = e / s + eps
        dist_ref[:, m * atom_pad:(m + 1) * atom_pad] = dist_m.astype(dist_ref.dtype)
        logit_ref[:, m:m + 1] = jnp.sum(dist_m * z, axis=-1,
                                        keepdims=True).astype(logit_ref.dtype)


# -----------------------------------------------------------------------------
# Parameter init / NoisyLinear handling (wrapper side)
# -----------------------------------------------------------------------------
def _round_up(x, m):
    return ((x + m - 1) // m) * m


def _scale_noise(key, n):
    v = jax.random.normal(key, (n,), jnp.float32)
    return jnp.sign(v) * jnp.sqrt(jnp.abs(v))


def init_noisy_linear_params(key, fan_in, fan_out, sigma0=0.4):
    """Matches ding NoiseLinearLayer.reset_parameters; weights stored as (in, out)."""
    kw, kb = jax.random.split(key)
    stdv = 1.0 / math.sqrt(fan_in)
    return dict(
        w_mu=jax.random.uniform(kw, (fan_in, fan_out), jnp.float32, -stdv, stdv),
        b_mu=jax.random.uniform(kb, (1, fan_out), jnp.float32, -stdv, stdv),
        w_sigma=jnp.full((fan_in, fan_out), sigma0 / math.sqrt(fan_in), jnp.float32),
        b_sigma=jnp.full((1, fan_out), sigma0 / math.sqrt(fan_out), jnp.float32),
    )


def init_rainbow_head_params(key, hidden_size, output_size, n_atom=51):
    ka1, ka2, kq1, kq2 = jax.random.split(key, 4)
    return dict(
        a1=init_noisy_linear_params(ka1, hidden_size, hidden_size),
        a2=init_noisy_linear_params(ka2, hidden_size, output_size * n_atom),
        q1=init_noisy_linear_params(kq1, hidden_size, hidden_size),
        q2=init_noisy_linear_params(kq2, hidden_size, n_atom),
    )


def effective_layers(params, noise_key=None):
    """NoiseLinearLayer forward: training mode resamples factorized noise each call,
    eval mode (noise_key=None) uses mu only. Weight construction is per-forward and
    shared across the batch, so it lives in the wrapper, not the kernel."""
    names = ("a1", "a2", "q1", "q2")
    if noise_key is None:
        return {n: (params[n]["w_mu"], params[n]["b_mu"]) for n in names}
    keys = jax.random.split(noise_key, len(names))
    out = {}
    for n, k in zip(names, keys):
        layer = params[n]
        fan_in, fan_out = layer["w_mu"].shape
        k_in, k_out = jax.random.split(k)
        eps_in = _scale_noise(k_in, fan_in)
        eps_out = _scale_noise(k_out, fan_out)
        w = layer["w_mu"] + layer["w_sigma"] * (eps_in[:, None] * eps_out[None, :])
        b = layer["b_mu"] + layer["b_sigma"] * eps_out[None, :]
        out[n] = (w, b)
    return out


def _pack_fused_weights(layers, hidden_size, output_size, n_atom, atom_pad, compute_dtype):
    (w1a, b1a) = layers["a1"]
    (w2a, b2a) = layers["a2"]
    (w1q, b1q) = layers["q1"]
    (w2q, b2q) = layers["q2"]
    H, M = hidden_size, output_size
    pad = atom_pad - n_atom

    # Fused first layer: one (H, 2H) weight, one (1, 2H) bias.
    w1 = jnp.concatenate([w1a, w1q], axis=1).astype(compute_dtype)
    b1 = jnp.concatenate([b1a, b1q], axis=1).astype(jnp.float32)

    # Second layer: pad each action's atom block to a 128-lane-aligned chunk and fuse
    # A/Q block-diagonally so [h_a | h_q] feeds a single MXU pass.
    w2a_p = jnp.pad(w2a.reshape(H, M, n_atom),
                    ((0, 0), (0, 0), (0, pad))).reshape(H, M * atom_pad)
    b2a_p = jnp.pad(b2a.reshape(1, M, n_atom),
                    ((0, 0), (0, 0), (0, pad))).reshape(1, M * atom_pad)
    w2q_p = jnp.pad(w2q, ((0, 0), (0, pad)))
    b2q_p = jnp.pad(b2q, ((0, 0), (0, pad)))
    w2 = jnp.block([
        [w2a_p, jnp.zeros((H, atom_pad), jnp.float32)],
        [jnp.zeros((H, M * atom_pad), jnp.float32), w2q_p],
    ]).astype(compute_dtype)
    b2 = jnp.concatenate([b2a_p, b2q_p], axis=1).astype(jnp.float32)
    return w1, b1, w2, b2


# -----------------------------------------------------------------------------
# Forward wrapper
# -----------------------------------------------------------------------------
def rainbow_head_forward(x, params, *, output_size, n_atom=51, v_min=-10.0, v_max=10.0,
                         eps=1e-6, noise_key=None, compute_dtype=jnp.float32, tile_b=128):
    """x: (B, hidden_size). Returns {'logit': (B, M), 'distribution': (B, M, n_atom)}."""
    B, H = x.shape
    M = output_size
    atom_pad = _round_up(n_atom, 128)          # lane-aligned per-action atom chunk
    C = (M + 1) * atom_pad

    layers = effective_layers(params, noise_key)
    w1, b1, w2, b2 = _pack_fused_weights(layers, H, M, n_atom, atom_pad, compute_dtype)

    # Batch tiling. tile_b should be raised (256-512) for large batches, subject to the
    # VMEM budget (64 MiB on v7x): weights + 2x double-buffered (TB, C) output tiles.
    tb = min(tile_b, _round_up(B, 8))
    Bp = _round_up(B, tb)
    xp = x.astype(compute_dtype)
    if Bp != B:
        xp = jnp.pad(xp, ((0, Bp - B), (0, 0)))

    kernel = functools.partial(
        rainbow_head_kernel, output_size=M, n_atom=n_atom, atom_pad=atom_pad,
        v_min=float(v_min), v_max=float(v_max), eps=float(eps))

    logit_p, dist_p = pl.pallas_call(
        kernel,
        out_shape=(jax.ShapeDtypeStruct((Bp, M), jnp.float32),
                   jax.ShapeDtypeStruct((Bp, M * atom_pad), jnp.float32)),
        grid=(Bp // tb,),
        in_specs=[
            pl.BlockSpec((tb, H), lambda i: (i, 0)),        # x: batch-tiled, pipelined
            pl.BlockSpec((H, 2 * H), lambda i: (0, 0)),     # fused weights: VMEM-resident
            pl.BlockSpec((1, 2 * H), lambda i: (0, 0)),
            pl.BlockSpec((2 * H, C), lambda i: (0, 0)),
            pl.BlockSpec((1, C), lambda i: (0, 0)),
        ],
        out_specs=(
            pl.BlockSpec((tb, M), lambda i: (i, 0)),
            pl.BlockSpec((tb, M * atom_pad), lambda i: (i, 0)),   # lane-dense dist slab
        ),
        compiler_params=pltpu.CompilerParams(
            dimension_semantics=("parallel",)),                   # split batch over 2 TCs on v7x
    )(xp, w1, b1, w2, b2)

    logit = logit_p[:B]
    dist = dist_p[:B].reshape(B, M, atom_pad)[:, :, :n_atom]       # wrapper-side layout plumbing
    return {"logit": logit, "distribution": dist}


# -----------------------------------------------------------------------------
# Pure-JAX reference (mirrors the torch graph, from per-layer effective weights)
# -----------------------------------------------------------------------------
def rainbow_head_reference(x, layers, output_size, n_atom, v_min, v_max, eps):
    (w1a, b1a) = layers["a1"]
    (w2a, b2a) = layers["a2"]
    (w1q, b1q) = layers["q1"]
    (w2q, b2q) = layers["q2"]
    B = x.shape[0]
    ha = jnp.maximum(x @ w1a + b1a, 0.0)
    a = (ha @ w2a + b2a).reshape(B, output_size, n_atom)
    hq = jnp.maximum(x @ w1q + b1q, 0.0)
    q = (hq @ w2q + b2q).reshape(B, 1, n_atom)
    q = q + a - a.mean(axis=1, keepdims=True)
    dist = jax.nn.softmax(q, axis=-1) + eps
    z = jnp.linspace(v_min, v_max, n_atom)
    logit = (dist * z).sum(-1)
    return logit, dist


if __name__ == "__main__":
    hidden_size = 32
    output_size = 16
    n_atom = 51
    batch = 4

    key = jax.random.PRNGKey(0)
    kx, kp, kn = jax.random.split(key, 3)
    x = jax.random.normal(kx, (batch, hidden_size), jnp.float32)
    params = init_rainbow_head_params(kp, hidden_size, output_size, n_atom)

    # Shared reference effective weights (noise=True default -> noisy layers active).
    layers = effective_layers(params, kn)
    ref_logit, ref_dist = rainbow_head_reference(
        x, layers, output_size, n_atom, -10.0, 10.0, 1e-6)

    # ---- f32 run ------------------------------------------------------------
    out = rainbow_head_forward(x, params, output_size=output_size, n_atom=n_atom,
                               noise_key=kn, compute_dtype=jnp.float32)
    logit = jax.block_until_ready(out["logit"])
    dist = jax.block_until_ready(out["distribution"])
    assert logit.shape == (batch, output_size)
    assert dist.shape == (batch, output_size, n_atom)
    assert jnp.allclose(logit, ref_logit, atol=1e-1, rtol=2e-2)
    assert jnp.allclose(dist, ref_dist, atol=1e-2, rtol=2e-2)

    # ---- bf16 weights/activations (MXU fast path on v6e/v7x), f32 accumulation
    out_b = rainbow_head_forward(x, params, output_size=output_size, n_atom=n_atom,
                                 noise_key=kn, compute_dtype=jnp.bfloat16)
    logit_b = jax.block_until_ready(out_b["logit"])
    dist_b = jax.block_until_ready(out_b["distribution"])
    assert jnp.allclose(logit_b, ref_logit, atol=5e-1, rtol=5e-2)
    assert jnp.allclose(dist_b, ref_dist, atol=2e-2, rtol=1e-1)

    print("KERNEL_OK")
</pallas_src>

<mosaic_0001>
module attributes {stable_mosaic.version = 11 : i64} {
  func.func @rainbow_head_kernel(%arg0: i32, %arg1: memref<8x32xf32, #tpu.memory_space<vmem>>, %arg2: memref<32x64xf32, #tpu.memory_space<vmem>>, %arg3: memref<1x64xf32, #tpu.memory_space<vmem>>, %arg4: memref<64x2176xf32, #tpu.memory_space<vmem>>, %arg5: memref<1x2176xf32, #tpu.memory_space<vmem>>, %arg6: memref<8x16xf32, #tpu.memory_space<vmem>>, %arg7: memref<8x2048xf32, #tpu.memory_space<vmem>>) attributes {dimension_semantics = [#tpu.dimension_semantics<parallel>], iteration_bounds = array<i64: 1>, scalar_prefetch = 0 : i64, scratch_operands = 0 : i64, tpu.core_type = #tpu.core_type<tc>, window_params = [{transform_indices = @transform_0, window_bounds = array<i64: 8, 32>}, {pipeline_mode = #tpu.pipeline_mode<synchronous>, transform_indices = @transform_1, window_bounds = array<i64: 32, 64>}, {pipeline_mode = #tpu.pipeline_mode<synchronous>, transform_indices = @transform_2, window_bounds = array<i64: 1, 64>}, {pipeline_mode = #tpu.pipeline_mode<synchronous>, transform_indices = @transform_3, window_bounds = array<i64: 64, 2176>}, {pipeline_mode = #tpu.pipeline_mode<synchronous>, transform_indices = @transform_4, window_bounds = array<i64: 1, 2176>}, {transform_indices = @transform_5, window_bounds = array<i64: 8, 16>}, {transform_indices = @transform_6, window_bounds = array<i64: 8, 2048>}]} {
    %c0 = arith.constant 0 : index
    %c0_0 = arith.constant 0 : index
    %0 = vector.load %arg1[%c0, %c0_0] : memref<8x32xf32, #tpu.memory_space<vmem>>, vector<8x32xf32>
    %c0_1 = arith.constant 0 : index
    %c0_2 = arith.constant 0 : index
    %1 = vector.load %arg2[%c0_1, %c0_2] : memref<32x64xf32, #tpu.memory_space<vmem>>, vector<32x64xf32>
    %cst = arith.constant dense<0.000000e+00> : vector<8x64xf32>
    %2 = tpu.matmul %0, %1, %cst {dimension_numbers = #tpu.dot_dimension_numbers<[1], [0], [0], [1], [0, 0, 1, 1], [], []>} : vector<8x32xf32>, vector<32x64xf32>, vector<8x64xf32> -> vector<8x64xf32>
    %c0_3 = arith.constant 0 : index
    %c0_4 = arith.constant 0 : index
    %3 = vector.load %arg3[%c0_3, %c0_4] : memref<1x64xf32, #tpu.memory_space<vmem>>, vector<1x64xf32>
    %4 = vector.broadcast %3 : vector<1x64xf32> to vector<8x64xf32>
    %5 = arith.addf %2, %4 : vector<8x64xf32>
    %cst_5 = arith.constant 0.000000e+00 : f32
    %6 = vector.broadcast %cst_5 : f32 to vector<8x64xf32>
    %7 = arith.maximumf %5, %6 : vector<8x64xf32>
    %c0_6 = arith.constant 0 : index
    %c0_7 = arith.constant 0 : index
    %8 = vector.load %arg4[%c0_6, %c0_7] : memref<64x2176xf32, #tpu.memory_space<vmem>>, vector<64x2176xf32>
    %cst_8 = arith.constant dense<0.000000e+00> : vector<8x2176xf32>
    %9 = tpu.matmul %7, %8, %cst_8 {dimension_numbers = #tpu.dot_dimension_numbers<[1], [0], [0], [1], [0, 0, 1, 1], [], []>} : vector<8x64xf32>, vector<64x2176xf32>, vector<8x2176xf32> -> vector<8x2176xf32>
    %c0_9 = arith.constant 0 : index
    %c0_10 = arith.constant 0 : index
    %10 = vector.load %arg5[%c0_9, %c0_10] : memref<1x2176xf32, #tpu.memory_space<vmem>>, vector<1x2176xf32>
    %11 = vector.broadcast %10 : vector<1x2176xf32> to vector<8x2176xf32>
    %12 = arith.addf %9, %11 : vector<8x2176xf32>
    %13 = tpu.iota {dimensions = array<i32: 1>} : vector<8x128xi32>
    %c51_i32 = arith.constant 51 : i32
    %14 = vector.broadcast %c51_i32 : i32 to vector<8x128xi32>
    %15 = arith.cmpi slt, %13, %14 : vector<8x128xi32>
    %16 = arith.sitofp %13 : vector<8x128xi32> to vector<8x128xf32>
    %cst_11 = arith.constant 4.000000e-01 : f32
    %17 = vector.broadcast %cst_11 : f32 to vector<8x128xf32>
    %18 = arith.mulf %16, %17 : vector<8x128xf32>
    %cst_12 = arith.constant -1.000000e+01 : f32
    %19 = vector.broadcast %cst_12 : f32 to vector<8x128xf32>
    %20 = arith.addf %19, %18 : vector<8x128xf32>
    %cst_13 = arith.constant 0.000000e+00 : f32
    %21 = vector.broadcast %cst_13 : f32 to vector<8x128xf32>
    %22 = arith.select %15, %20, %21 : vector<8x128xi1>, vector<8x128xf32>
    %23 = vector.extract_strided_slice %12 {offsets = [0, 0], sizes = [8, 128], strides = [1, 1]} : vector<8x2176xf32> to vector<8x128xf32>
    %24 = vector.extract_strided_slice %12 {offsets = [0, 128], sizes = [8, 128], strides = [1, 1]} : vector<8x2176xf32> to vector<8x128xf32>
    %25 = arith.addf %23, %24 : vector<8x128xf32>
    %26 = vector.extract_strided_slice %12 {offsets = [0, 256], sizes = [8, 128], strides = [1, 1]} : vector<8x2176xf32> to vector<8x128xf32>
    %27 = arith.addf %25, %26 : vector<8x128xf32>
    %28 = vector.extract_strided_slice %12 {offsets = [0, 384], sizes = [8, 128], strides = [1, 1]} : vector<8x2176xf32> to vector<8x128xf32>
    %29 = arith.addf %27, %28 : vector<8x128xf32>
    %30 = vector.extract_strided_slice %12 {offsets = [0, 512], sizes = [8, 128], strides = [1, 1]} : vector<8x2176xf32> to vector<8x128xf32>
    %31 = arith.addf %29, %30 : vector<8x128xf32>
    %32 = vector.extract_strided_slice %12 {offsets = [0, 640], sizes = [8, 128], strides = [1, 1]} : vector<8x2176xf32> to vector<8x128xf32>
    %33 = arith.addf %31, %32 : vector<8x128xf32>
    %34 = vector.extract_strided_slice %12 {offsets = [0, 768], sizes = [8, 128], strides = [1, 1]} : vector<8x2176xf32> to vector<8x128xf32>
    %35 = arith.addf %33, %34 : vector<8x128xf32>
    %36 = vector.extract_strided_slice %12 {offsets = [0, 896], sizes = [8, 128], strides = [1, 1]} : vector<8x2176xf32> to vector<8x128xf32>
    %37 = arith.addf %35, %36 : vector<8x128xf32>
    %38 = vector.extract_strided_slice %12 {offsets = [0, 1024], sizes = [8, 128], strides = [1, 1]} : vector<8x2176xf32> to vector<8x128xf32>
    %39 = arith.addf %37, %38 : vector<8x128xf32>
    %40 = vector.extract_strided_slice %12 {offsets = [0, 1152], sizes = [8, 128], strides = [1, 1]} : vector<8x2176xf32> to vector<8x128xf32>
    %41 = arith.addf %39, %40 : vector<8x128xf32>
    %42 = vector.extract_strided_slice %12 {offsets = [0, 1280], sizes = [8, 128], strides = [1, 1]} : vector<8x2176xf32> to vector<8x128xf32>
    %43 = arith.addf %41, %42 : vector<8x128xf32>
    %44 = vector.extract_strided_slice %12 {offsets = [0, 1408], sizes = [8, 128], strides = [1, 1]} : vector<8x2176xf32> to vector<8x128xf32>
    %45 = arith.addf %43, %44 : vector<8x128xf32>
    %46 = vector.extract_strided_slice %12 {offsets = [0, 1536], sizes = [8, 128], strides = [1, 1]} : vector<8x2176xf32> to vector<8x128xf32>
    %47 = arith.addf %45, %46 : vector<8x128xf32>
    %48 = vector.extract_strided_slice %12 {offsets = [0, 1664], sizes = [8, 128], strides = [1, 1]} : vector<8x2176xf32> to vector<8x128xf32>
    %49 = arith.addf %47, %48 : vector<8x128xf32>
    %50 = vector.extract_strided_slice %12 {offsets = [0, 1792], sizes = [8, 128], strides = [1, 1]} : vector<8x2176xf32> to vector<8x128xf32>
    %51 = arith.addf %49, %50 : vector<8x128xf32>
    %52 = vector.extract_strided_slice %12 {offsets = [0, 1920], sizes = [8, 128], strides = [1, 1]} : vector<8x2176xf32> to vector<8x128xf32>
    %53 = arith.addf %51, %52 : vector<8x128xf32>
    %54 = vector.extract_strided_slice %12 {offsets = [0, 2048], sizes = [8, 128], strides = [1, 1]} : vector<8x2176xf32> to vector<8x128xf32>
    %cst_14 = arith.constant 6.250000e-02 : f32
    %55 = vector.broadcast %cst_14 : f32 to vector<8x128xf32>
    %56 = arith.mulf %53, %55 : vector<8x128xf32>
    %57 = arith.subf %54, %56 : vector<8x128xf32>
    %58 = vector.extract_strided_slice %12 {offsets = [0, 0], sizes = [8, 128], strides = [1, 1]} : vector<8x2176xf32> to vector<8x128xf32>
    %59 = arith.addf %58, %57 : vector<8x128xf32>
    %cst_15 = arith.constant -1.000000e+30 : f32
    %60 = vector.broadcast %cst_15 : f32 to vector<8x128xf32>
    %61 = arith.select %15, %59, %60 : vector<8x128xi1>, vector<8x128xf32>
    %cst_16 = arith.constant dense<0xFF800000> : vector<8xf32>
    %62 = vector.multi_reduction <maximumf>, %61, %cst_16 [1] : vector<8x128xf32> to vector<8xf32>
    %63 = vector.shape_cast %62 : vector<8xf32> to vector<8x1xf32>
    %64 = vector.broadcast %63 : vector<8x1xf32> to vector<8x128xf32>
    %65 = arith.subf %61, %64 : vector<8x128xf32>
    %66 = math.exp %65 : vector<8x128xf32>
    %cst_17 = arith.constant dense<0.000000e+00> : vector<8xf32>
    %67 = vector.multi_reduction <add>, %66, %cst_17 [1] : vector<8x128xf32> to vector<8xf32>
    %68 = vector.shape_cast %67 : vector<8xf32> to vector<8x1xf32>
    %69 = vector.broadcast %68 : vector<8x1xf32> to vector<8x128xf32>
    %70 = arith.divf %66, %69 : vector<8x128xf32>
    %cst_18 = arith.constant 9.99999997E-7 : f32
    %71 = vector.broadcast %cst_18 : f32 to vector<8x128xf32>
    %72 = arith.addf %70, %71 : vector<8x128xf32>
    %c0_19 = arith.constant 0 : index
    %c0_20 = arith.constant 0 : index
    %73 = vector.load %arg7[%c0_19, %c0_20] : memref<8x2048xf32, #tpu.memory_space<vmem>>, vector<8x128xf32>
    tpu.vector_store %arg7[%c0_19, %c0_20], %72 {strides = array<i32>} : memref<8x2048xf32, #tpu.memory_space<vmem>>, vector<8x128xf32>,
    %74 = arith.mulf %72, %22 : vector<8x128xf32>
    %cst_21 = arith.constant dense<0.000000e+00> : vector<8xf32>
    %75 = vector.multi_reduction <add>, %74, %cst_21 [1] : vector<8x128xf32> to vector<8xf32>
    %76 = vector.shape_cast %75 : vector<8xf32> to vector<8x1xf32>
    %c0_22 = arith.constant 0 : index
    %c0_23 = arith.constant 0 : index
    %77 = vector.load %arg6[%c0_22, %c0_23] : memref<8x16xf32, #tpu.memory_space<vmem>>, vector<8x1xf32>
    tpu.vector_store %arg6[%c0_22, %c0_23], %76 {strides = array<i32>} : memref<8x16xf32, #tpu.memory_space<vmem>>, vector<8x1xf32>,
    %78 = vector.extract_strided_slice %12 {offsets = [0, 128], sizes = [8, 128], strides = [1, 1]} : vector<8x2176xf32> to vector<8x128xf32>
    %79 = arith.addf %78, %57 : vector<8x128xf32>
    %cst_24 = arith.constant -1.000000e+30 : f32
    %80 = vector.broadcast %cst_24 : f32 to vector<8x128xf32>
    %81 = arith.select %15, %79, %80 : vector<8x128xi1>, vector<8x128xf32>
    %cst_25 = arith.constant dense<0xFF800000> : vector<8xf32>
    %82 = vector.multi_reduction <maximumf>, %81, %cst_25 [1] : vector<8x128xf32> to vector<8xf32>
    %83 = vector.shape_cast %82 : vector<8xf32> to vector<8x1xf32>
    %84 = vector.broadcast %83 : vector<8x1xf32> to vector<8x128xf32>
    %85 = arith.subf %81, %84 : vector<8x128xf32>
    %86 = math.exp %85 : vector<8x128xf32>
    %cst_26 = arith.constant dense<0.000000e+00> : vector<8xf32>
    %87 = vector.multi_reduction <add>, %86, %cst_26 [1] : vector<8x128xf32> to vector<8xf32>
    %88 = vector.shape_cast %87 : vector<8xf32> to vector<8x1xf32>
    %89 = vector.broadcast %88 : vector<8x1xf32> to vector<8x128xf32>
    %90 = arith.divf %86, %89 : vector<8x128xf32>
    %cst_27 = arith.constant 9.99999997E-7 : f32
    %91 = vector.broadcast %cst_27 : f32 to vector<8x128xf32>
    %92 = arith.addf %90, %91 : vector<8x128xf32>
    %c0_28 = arith.constant 0 : index
    %c128 = arith.constant 128 : index
    %93 = vector.load %arg7[%c0_28, %c128] : memref<8x2048xf32, #tpu.memory_space<vmem>>, vector<8x128xf32>
    tpu.vector_store %arg7[%c0_28, %c128], %92 {strides = array<i32>} : memref<8x2048xf32, #tpu.memory_space<vmem>>, vector<8x128xf32>,
    %94 = arith.mulf %92, %22 : vector<8x128xf32>
    %cst_29 = arith.constant dense<0.000000e+00> : vector<8xf32>
    %95 = vector.multi_reduction <add>, %94, %cst_29 [1] : vector<8x128xf32> to vector<8xf32>
    %96 = vector.shape_cast %95 : vector<8xf32> to vector<8x1xf32>
    %c0_30 = arith.constant 0 : index
    %c1 = arith.constant 1 : index
    %97 = vector.load %arg6[%c0_30, %c1] : memref<8x16xf32, #tpu.memory_space<vmem>>, vector<8x1xf32>
    tpu.vector_store %arg6[%c0_30, %c1], %96 {strides = array<i32>} : memref<8x16xf32, #tpu.memory_space<vmem>>, vector<8x1xf32>,
    %98 = vector.extract_strided_slice %12 {offsets = [0, 256], sizes = [8, 128], strides = [1, 1]} : vector<8x2176xf32> to vector<8x128xf32>
    %99 = arith.addf %98, %57 : vector<8x128xf32>
    %cst_31 = arith.constant -1.000000e+30 : f32
    %100 = vector.broadcast %cst_31 : f32 to vector<8x128xf32>
    %101 = arith.select %15, %99, %100 : vector<8x128xi1>, vector<8x128xf32>
    %cst_32 = arith.constant dense<0xFF800000> : vector<8xf32>
    %102 = vector.multi_reduction <maximumf>, %101, %cst_32 [1] : vector<8x128xf32> to vector<8xf32>
    %103 = vector.shape_cast %102 : vector<8xf32> to vector<8x1xf32>
    %104 = vector.broadcast %103 : vector<8x1xf32> to vector<8x128xf32>
    %105 = arith.subf %101, %104 : vector<8x128xf32>
    %106 = math.exp %105 : vector<8x128xf32>
    %cst_33 = arith.constant dense<0.000000e+00> : vector<8xf32>
    %107 = vector.multi_reduction <add>, %106, %cst_33 [1] : vector<8x128xf32> to vector<8xf32>
    %108 = vector.shape_cast %107 : vector<8xf32> to vector<8x1xf32>
    %109 = vector.broadcast %108 : vector<8x1xf32> to vector<8x128xf32>
    %110 = arith.divf %106, %109 : vector<8x128xf32>
    %cst_34 = arith.constant 9.99999997E-7 : f32
    %111 = vector.broadcast %cst_34 : f32 to vector<8x128xf32>
    %112 = arith.addf %110, %111 : vector<8x128xf32>
    %c0_35 = arith.constant 0 : index
    %c256 = arith.constant 256 : index
    %113 = vector.load %arg7[%c0_35, %c256] : memref<8x2048xf32, #tpu.memory_space<vmem>>, vector<8x128xf32>
    tpu.vector_store %arg7[%c0_35, %c256], %112 {strides = array<i32>} : memref<8x2048xf32, #tpu.memory_space<vmem>>, vector<8x128xf32>,
    %114 = arith.mulf %112, %22 : vector<8x128xf32>
    %cst_36 = arith.constant dense<0.000000e+00> : vector<8xf32>
    %115 = vector.multi_reduction <add>, %114, %cst_36 [1] : vector<8x128xf32> to vector<8xf32>
    %116 = vector.shape_cast %115 : vector<8xf32> to vector<8x1xf32>
    %c0_37 = arith.constant 0 : index
    %c2 = arith.constant 2 : index
    %117 = vector.load %arg6[%c0_37, %c2] : memref<8x16xf32, #tpu.memory_space<vmem>>, vector<8x1xf32>
    tpu.vector_store %arg6[%c0_37, %c2], %116 {strides = array<i32>} : memref<8x16xf32, #tpu.memory_space<vmem>>, vector<8x1xf32>,
    %118 = vector.extract_strided_slice %12 {offsets = [0, 384], sizes = [8, 128], strides = [1, 1]} : vector<8x2176xf32> to vector<8x128xf32>
    %119 = arith.addf %118, %57 : vector<8x128xf32>
    %cst_38 = arith.constant -1.000000e+30 : f32
    %120 = vector.broadcast %cst_38 : f32 to vector<8x128xf32>
    %121 = arith.select %15, %119, %120 : vector<8x128xi1>, vector<8x128xf32>
    %cst_39 = arith.constant dense<0xFF800000> : vector<8xf32>
    %122 = vector.multi_reduction <maximumf>, %121, %cst_39 [1] : vector<8x128xf32> to vector<8xf32>
    %123 = vector.shape_cast %122 : vector<8xf32> to vector<8x1xf32>
    %124 = vector.broadcast %123 : vector<8x1xf32> to vector<8x128xf32>
    %125 = arith.subf %121, %124 : vector<8x128xf32>
    %126 = math.exp %125 : vector<8x128xf32>
    %cst_40 = arith.constant dense<0.000000e+00> : vector<8xf32>
    %127 = vector.multi_reduction <add>, %126, %cst_40 [1] : vector<8x128xf32> to vector<8xf32>
    %128 = vector.shape_cast %127 : vector<8xf32> to vector<8x1xf32>
    %129 = vector.broadcast %128 : vector<8x1xf32> to vector<8x128xf32>
    %130 = arith.divf %126, %129 : vector<8x128xf32>
    %cst_41 = arith.constant 9.99999997E-7 : f32
    %131 = vector.broadcast %cst_41 : f32 to vector<8x128xf32>
    %132 = arith.addf %130, %131 : vector<8x128xf32>
    %c0_42 = arith.constant 0 : index
    %c384 = arith.constant 384 : index
    %133 = vector.load %arg7[%c0_42, %c384] : memref<8x2048xf32, #tpu.memory_space<vmem>>, vector<8x128xf32>
    tpu.vector_store %arg7[%c0_42, %c384], %132 {strides = array<i32>} : memref<8x2048xf32, #tpu.memory_space<vmem>>, vector<8x128xf32>,
    %134 = arith.mulf %132, %22 : vector<8x128xf32>
    %cst_43 = arith.constant dense<0.000000e+00> : vector<8xf32>
    %135 = vector.multi_reduction <add>, %134, %cst_43 [1] : vector<8x128xf32> to vector<8xf32>
    %136 = vector.shape_cast %135 : vector<8xf32> to vector<8x1xf32>
    %c0_44 = arith.constant 0 : index
    %c3 = arith.constant 3 : index
    %137 = vector.load %arg6[%c0_44, %c3] : memref<8x16xf32, #tpu.memory_space<vmem>>, vector<8x1xf32>
    tpu.vector_store %arg6[%c0_44, %c3], %136 {strides = array<i32>} : memref<8x16xf32, #tpu.memory_space<vmem>>, vector<8x1xf32>,
    %138 = vector.extract_strided_slice %12 {offsets = [0, 512], sizes = [8, 128], strides = [1, 1]} : vector<8x2176xf32> to vector<8x128xf32>
    %139 = arith.addf %138, %57 : vector<8x128xf32>
    %cst_45 = arith.constant -1.000000e+30 : f32
    %140 = vector.broadcast %cst_45 : f32 to vector<8x128xf32>
    %141 = arith.select %15, %139, %140 : vector<8x128xi1>, vector<8x128xf32>
    %cst_46 = arith.constant dense<0xFF800000> : vector<8xf32>
    %142 = vector.multi_reduction <maximumf>, %141, %cst_46 [1] : vector<8x128xf32> to vector<8xf32>
    %143 = vector.shape_cast %142 : vector<8xf32> to vector<8x1xf32>
    %144 = vector.broadcast %143 : vector<8x1xf32> to vector<8x128xf32>
    %145 = arith.subf %141, %144 : vector<8x128xf32>
    %146 = math.exp %145 : vector<8x128xf32>
    %cst_47 = arith.constant dense<0.000000e+00> : vector<8xf32>
    %147 = vector.multi_reduction <add>, %146, %cst_47 [1] : vector<8x128xf32> to vector<8xf32>
    %148 = vector.shape_cast %147 : vector<8xf32> to vector<8x1xf32>
    %149 = vector.broadcast %148 : vector<8x1xf32> to vector<8x128xf32>
    %150 = arith.divf %146, %149 : vector<8x128xf32>
    %cst_48 = arith.constant 9.99999997E-7 : f32
    %151 = vector.broadcast %cst_48 : f32 to vector<8x128xf32>
    %152 = arith.addf %150, %151 : vector<8x128xf32>
    %c0_49 = arith.constant 0 : index
    %c512 = arith.constant 512 : index
    %153 = vector.load %arg7[%c0_49, %c512] : memref<8x2048xf32, #tpu.memory_space<vmem>>, vector<8x128xf32>
    tpu.vector_store %arg7[%c0_49, %c512], %152 {strides = array<i32>} : memref<8x2048xf32, #tpu.memory_space<vmem>>, vector<8x128xf32>,
    %154 = arith.mulf %152, %22 : vector<8x128xf32>
    %cst_50 = arith.constant dense<0.000000e+00> : vector<8xf32>
    %155 = vector.multi_reduction <add>, %154, %cst_50 [1] : vector<8x128xf32> to vector<8xf32>
    %156 = vector.shape_cast %155 : vector<8xf32> to vector<8x1xf32>
    %c0_51 = arith.constant 0 : index
    %c4 = arith.constant 4 : index
    %157 = vector.load %arg6[%c0_51, %c4] : memref<8x16xf32, #tpu.memory_space<vmem>>, vector<8x1xf32>
    tpu.vector_store %arg6[%c0_51, %c4], %156 {strides = array<i32>} : memref<8x16xf32, #tpu.memory_space<vmem>>, vector<8x1xf32>,
    %158 = vector.extract_strided_slice %12 {offsets = [0, 640], sizes = [8, 128], strides = [1, 1]} : vector<8x2176xf32> to vector<8x128xf32>
    %159 = arith.addf %158, %57 : vector<8x128xf32>
    %cst_52 = arith.constant -1.000000e+30 : f32
    %160 = vector.broadcast %cst_52 : f32 to vector<8x128xf32>
    %161 = arith.select %15, %159, %160 : vector<8x128xi1>, vector<8x128xf32>
    %cst_53 = arith.constant dense<0xFF800000> : vector<8xf32>
    %162 = vector.multi_reduction <maximumf>, %161, %cst_53 [1] : vector<8x128xf32> to vector<8xf32>
    %163 = vector.shape_cast %162 : vector<8xf32> to vector<8x1xf32>
    %164 = vector.broadcast %163 : vector<8x1xf32> to vector<8x128xf32>
    %165 = arith.subf %161, %164 : vector<8x128xf32>
    %166 = math.exp %165 : vector<8x128xf32>
    %cst_54 = arith.constant dense<0.000000e+00> : vector<8xf32>
    %167 = vector.multi_reduction <add>, %166, %cst_54 [1] : vector<8x128xf32> to vector<8xf32>
    %168 = vector.shape_cast %167 : vector<8xf32> to vector<8x1xf32>
    %169 = vector.broadcast %168 : vector<8x1xf32> to vector<8x128xf32>
    %170 = arith.divf %166, %169 : vector<8x128xf32>
    %cst_55 = arith.constant 9.99999997E-7 : f32
    %171 = vector.broadcast %cst_55 : f32 to vector<8x128xf32>
    %172 = arith.addf %170, %171 : vector<8x128xf32>
    %c0_56 = arith.constant 0 : index
    %c640 = arith.constant 640 : index
    %173 = vector.load %arg7[%c0_56, %c640] : memref<8x2048xf32, #tpu.memory_space<vmem>>, vector<8x128xf32>
    tpu.vector_store %arg7[%c0_56, %c640], %172 {strides = array<i32>} : memref<8x2048xf32, #tpu.memory_space<vmem>>, vector<8x128xf32>,
    %174 = arith.mulf %172, %22 : vector<8x128xf32>
    %cst_57 = arith.constant dense<0.000000e+00> : vector<8xf32>
    %175 = vector.multi_reduction <add>, %174, %cst_57 [1] : vector<8x128xf32> to vector<8xf32>
    %176 = vector.shape_cast %175 : vector<8xf32> to vector<8x1xf32>
    %c0_58 = arith.constant 0 : index
    %c5 = arith.constant 5 : index
    %177 = vector.load %arg6[%c0_58, %c5] : memref<8x16xf32, #tpu.memory_space<vmem>>, vector<8x1xf32>
    tpu.vector_store %arg6[%c0_58, %c5], %176 {strides = array<i32>} : memref<8x16xf32, #tpu.memory_space<vmem>>, vector<8x1xf32>,
    %178 = vector.extract_strided_slice %12 {offsets = [0, 768], sizes = [8, 128], strides = [1, 1]} : vector<8x2176xf32> to vector<8x128xf32>
    %179 = arith.addf %178, %57 : vector<8x128xf32>
    %cst_59 = arith.constant -1.000000e+30 : f32
    %180 = vector.broadcast %cst_59 : f32 to vector<8x128xf32>
    %181 = arith.select %15, %179, %180 : vector<8x128xi1>, vector<8x128xf32>
    %cst_60 = arith.constant dense<0xFF800000> : vector<8xf32>
    %182 = vector.multi_reduction <maximumf>, %181, %cst_60 [1] : vector<8x128xf32> to vector<8xf32>
    %183 = vector.shape_cast %182 : vector<8xf32> to vector<8x1xf32>
    %184 = vector.broadcast %183 : vector<8x1xf32> to vector<8x128xf32>
    %185 = arith.subf %181, %184 : vector<8x128xf32>
    %186 = math.exp %185 : vector<8x128xf32>
    %cst_61 = arith.constant dense<0.000000e+00> : vector<8xf32>
    %187 = vector.multi_reduction <add>, %186, %cst_61 [1] : vector<8x128xf32> to vector<8xf32>
    %188 = vector.shape_cast %187 : vector<8xf32> to vector<8x1xf32>
    %189 = vector.broadcast %188 : vector<8x1xf32> to vector<8x128xf32>
    %190 = arith.divf %186, %189 : vector<8x128xf32>
    %cst_62 = arith.constant 9.99999997E-7 : f32
    %191 = vector.broadcast %cst_62 : f32 to vector<8x128xf32>
    %192 = arith.addf %190, %191 : vector<8x128xf32>
    %c0_63 = arith.constant 0 : index
    %c768 = arith.constant 768 : index
    %193 = vector.load %arg7[%c0_63, %c768] : memref<8x2048xf32, #tpu.memory_space<vmem>>, vector<8x128xf32>
    tpu.vector_store %arg7[%c0_63, %c768], %192 {strides = array<i32>} : memref<8x2048xf32, #tpu.memory_space<vmem>>, vector<8x128xf32>,
    %194 = arith.mulf %192, %22 : vector<8x128xf32>
    %cst_64 = arith.constant dense<0.000000e+00> : vector<8xf32>
    %195 = vector.multi_reduction <add>, %194, %cst_64 [1] : vector<8x128xf32> to vector<8xf32>
    %196 = vector.shape_cast %195 : vector<8xf32> to vector<8x1xf32>
    %c0_65 = arith.constant 0 : index
    %c6 = arith.constant 6 : index
    %197 = vector.load %arg6[%c0_65, %c6] : memref<8x16xf32, #tpu.memory_space<vmem>>, vector<8x1xf32>
    tpu.vector_store %arg6[%c0_65, %c6], %196 {strides = array<i32>} : memref<8x16xf32, #tpu.memory_space<vmem>>, vector<8x1xf32>,
    %198 = vector.extract_strided_slice %12 {offsets = [0, 896], sizes = [8, 128], strides = [1, 1]} : vector<8x2176xf32> to vector<8x128xf32>
    %199 = arith.addf %198, %57 : vector<8x128xf32>
    %cst_66 = arith.constant -1.000000e+30 : f32
    %200 = vector.broadcast %cst_66 : f32 to vector<8x128xf32>
    %201 = arith.select %15, %199, %200 : vector<8x128xi1>, vector<8x128xf32>
    %cst_67 = arith.constant dense<0xFF800000> : vector<8xf32>
    %202 = vector.multi_reduction <maximumf>, %201, %cst_67 [1] : vector<8x128xf32> to vector<8xf32>
    %203 = vector.shape_cast %202 : vector<8xf32> to vector<8x1xf32>
    %204 = vector.broadcast %203 : vector<8x1xf32> to vector<8x128xf32>
    %205 = arith.subf %201, %204 : vector<8x128xf32>
    %206 = math.exp %205 : vector<8x128xf32>
    %cst_68 = arith.constant dense<0.000000e+00> : vector<8xf32>
    %207 = vector.multi_reduction <add>, %206, %cst_68 [1] : vector<8x128xf32> to vector<8xf32>
    %208 = vector.shape_cast %207 : vector<8xf32> to vector<8x1xf32>
    %209 = vector.broadcast %208 : vector<8x1xf32> to vector<8x128xf32>
    %210 = arith.divf %206, %209 : vector<8x128xf32>
    %cst_69 = arith.constant 9.99999997E-7 : f32
    %211 = vector.broadcast %cst_69 : f32 to vector<8x128xf32>
    %212 = arith.addf %210, %211 : vector<8x128xf32>
    %c0_70 = arith.constant 0 : index
    %c896 = arith.constant 896 : index
    %213 = vector.load %arg7[%c0_70, %c896] : memref<8x2048xf32, #tpu.memory_space<vmem>>, vector<8x128xf32>
    tpu.vector_store %arg7[%c0_70, %c896], %212 {strides = array<i32>} : memref<8x2048xf32, #tpu.memory_space<vmem>>, vector<8x128xf32>,
    %214 = arith.mulf %212, %22 : vector<8x128xf32>
    %cst_71 = arith.constant dense<0.000000e+00> : vector<8xf32>
    %215 = vector.multi_reduction <add>, %214, %cst_71 [1] : vector<8x128xf32> to vector<8xf32>
    %216 = vector.shape_cast %215 : vector<8xf32> to vector<8x1xf32>
    %c0_72 = arith.constant 0 : index
    %c7 = arith.constant 7 : index
    %217 = vector.load %arg6[%c0_72, %c7] : memref<8x16xf32, #tpu.memory_space<vmem>>, vector<8x1xf32>
    tpu.vector_store %arg6[%c0_72, %c7], %216 {strides = array<i32>} : memref<8x16xf32, #tpu.memory_space<vmem>>, vector<8x1xf32>,
    %218 = vector.extract_strided_slice %12 {offsets = [0, 1024], sizes = [8, 128], strides = [1, 1]} : vector<8x2176xf32> to vector<8x128xf32>
    %219 = arith.addf %218, %57 : vector<8x128xf32>
    %cst_73 = arith.constant -1.000000e+30 : f32
    %220 = vector.broadcast %cst_73 : f32 to vector<8x128xf32>
    %221 = arith.select %15, %219, %220 : vector<8x128xi1>, vector<8x128xf32>
    %cst_74 = arith.constant dense<0xFF800000> : vector<8xf32>
    %222 = vector.multi_reduction <maximumf>, %221, %cst_74 [1] : vector<8x128xf32> to vector<8xf32>
    %223 = vector.shape_cast %222 : vector<8xf32> to vector<8x1xf32>
    %224 = vector.broadcast %223 : vector<8x1xf32> to vector<8x128xf32>
    %225 = arith.subf %221, %224 : vector<8x128xf32>
    %226 = math.exp %225 : vector<8x128xf32>
    %cst_75 = arith.constant dense<0.000000e+00> : vector<8xf32>
    %227 = vector.multi_reduction <add>, %226, %cst_75 [1] : vector<8x128xf32> to vector<8xf32>
    %228 = vector.shape_cast %227 : vector<8xf32> to vector<8x1xf32>
    %229 = vector.broadcast %228 : vector<8x1xf32> to vector<8x128xf32>
    %230 = arith.divf %226, %229 : vector<8x128xf32>
    %cst_76 = arith.constant 9.99999997E-7 : f32
    %231 = vector.broadcast %cst_76 : f32 to vector<8x128xf32>
    %232 = arith.addf %230, %231 : vector<8x128xf32>
    %c0_77 = arith.constant 0 : index
    %c1024 = arith.constant 1024 : index
    %233 = vector.load %arg7[%c0_77, %c1024] : memref<8x2048xf32, #tpu.memory_space<vmem>>, vector<8x128xf32>
    tpu.vector_store %arg7[%c0_77, %c1024], %232 {strides = array<i32>} : memref<8x2048xf32, #tpu.memory_space<vmem>>, vector<8x128xf32>,
    %234 = arith.mulf %232, %22 : vector<8x128xf32>
    %cst_78 = arith.constant dense<0.000000e+00> : vector<8xf32>
    %235 = vector.multi_reduction <add>, %234, %cst_78 [1] : vector<8x128xf32> to vector<8xf32>
    %236 = vector.shape_cast %235 : vector<8xf32> to vector<8x1xf32>
    %c0_79 = arith.constant 0 : index
    %c8 = arith.constant 8 : index
    %237 = vector.load %arg6[%c0_79, %c8] : memref<8x16xf32, #tpu.memory_space<vmem>>, vector<8x1xf32>
    tpu.vector_store %arg6[%c0_79, %c8], %236 {strides = array<i32>} : memref<8x16xf32, #tpu.memory_space<vmem>>, vector<8x1xf32>,
    %238 = vector.extract_strided_slice %12 {offsets = [0, 1152], sizes = [8, 128], strides = [1, 1]} : vector<8x2176xf32> to vector<8x128xf32>
    %239 = arith.addf %238, %57 : vector<8x128xf32>
    %cst_80 = arith.constant -1.000000e+30 : f32
    %240 = vector.broadcast %cst_80 : f32 to vector<8x128xf32>
    %241 = arith.select %15, %239, %240 : vector<8x128xi1>, vector<8x128xf32>
    %cst_81 = arith.constant dense<0xFF800000> : vector<8xf32>
    %242 = vector.multi_reduction <maximumf>, %241, %cst_81 [1] : vector<8x128xf32> to vector<8xf32>
    %243 = vector.shape_cast %242 : vector<8xf32> to vector<8x1xf32>
    %244 = vector.broadcast %243 : vector<8x1xf32> to vector<8x128xf32>
    %245 = arith.subf %241, %244 : vector<8x128xf32>
    %246 = math.exp %245 : vector<8x128xf32>
    %cst_82 = arith.constant dense<0.000000e+00> : vector<8xf32>
    %247 = vector.multi_reduction <add>, %246, %cst_82 [1] : vector<8x128xf32> to vector<8xf32>
    %248 = vector.shape_cast %247 : vector<8xf32> to vector<8x1xf32>
    %249 = vector.broadcast %248 : vector<8x1xf32> to vector<8x128xf32>
    %250 = arith.divf %246, %249 : vector<8x128xf32>
    %cst_83 = arith.constant 9.99999997E-7 : f32
    %251 = vector.broadcast %cst_83 : f32 to vector<8x128xf32>
    %252 = arith.addf %250, %251 : vector<8x128xf32>
    %c0_84 = arith.constant 0 : index
    %c1152 = arith.constant 1152 : index
    %253 = vector.load %arg7[%c0_84, %c1152] : memref<8x2048xf32, #tpu.memory_space<vmem>>, vector<8x128xf32>
    tpu.vector_store %arg7[%c0_84, %c1152], %252 {strides = array<i32>} : memref<8x2048xf32, #tpu.memory_space<vmem>>, vector<8x128xf32>,
    %254 = arith.mulf %252, %22 : vector<8x128xf32>
    %cst_85 = arith.constant dense<0.000000e+00> : vector<8xf32>
    %255 = vector.multi_reduction <add>, %254, %cst_85 [1] : vector<8x128xf32> to vector<8xf32>
    %256 = vector.shape_cast %255 : vector<8xf32> to vector<8x1xf32>
    %c0_86 = arith.constant 0 : index
    %c9 = arith.constant 9 : index
    %257 = vector.load %arg6[%c0_86, %c9] : memref<8x16xf32, #tpu.memory_space<vmem>>, vector<8x1xf32>
    tpu.vector_store %arg6[%c0_86, %c9], %256 {strides = array<i32>} : memref<8x16xf32, #tpu.memory_space<vmem>>, vector<8x1xf32>,
    %258 = vector.extract_strided_slice %12 {offsets = [0, 1280], sizes = [8, 128], strides = [1, 1]} : vector<8x2176xf32> to vector<8x128xf32>
    %259 = arith.addf %258, %57 : vector<8x128xf32>
    %cst_87 = arith.constant -1.000000e+30 : f32
    %260 = vector.broadcast %cst_87 : f32 to vector<8x128xf32>
    %261 = arith.select %15, %259, %260 : vector<8x128xi1>, vector<8x128xf32>
    %cst_88 = arith.constant dense<0xFF800000> : vector<8xf32>
    %262 = vector.multi_reduction <maximumf>, %261, %cst_88 [1] : vector<8x128xf32> to vector<8xf32>
    %263 = vector.shape_cast %262 : vector<8xf32> to vector<8x1xf32>
    %264 = vector.broadcast %263 : vector<8x1xf32> to vector<8x128xf32>
    %265 = arith.subf %261, %264 : vector<8x128xf32>
    %266 = math.exp %265 : vector<8x128xf32>
    %cst_89 = arith.constant dense<0.000000e+00> : vector<8xf32>
    %267 = vector.multi_reduction <add>, %266, %cst_89 [1] : vector<8x128xf32> to vector<8xf32>
    %268 = vector.shape_cast %267 : vector<8xf32> to vector<8x1xf32>
    %269 = vector.broadcast %268 : vector<8x1xf32> to vector<8x128xf32>
    %270 = arith.divf %266, %269 : vector<8x128xf32>
    %cst_90 = arith.constant 9.99999997E-7 : f32
    %271 = vector.broadcast %cst_90 : f32 to vector<8x128xf32>
    %272 = arith.addf %270, %271 : vector<8x128xf32>
    %c0_91 = arith.constant 0 : index
    %c1280 = arith.constant 1280 : index
    %273 = vector.load %arg7[%c0_91, %c1280] : memref<8x2048xf32, #tpu.memory_space<vmem>>, vector<8x128xf32>
    tpu.vector_store %arg7[%c0_91, %c1280], %272 {strides = array<i32>} : memref<8x2048xf32, #tpu.memory_space<vmem>>, vector<8x128xf32>,
    %274 = arith.mulf %272, %22 : vector<8x128xf32>
    %cst_92 = arith.constant dense<0.000000e+00> : vector<8xf32>
    %275 = vector.multi_reduction <add>, %274, %cst_92 [1] : vector<8x128xf32> to vector<8xf32>
    %276 = vector.shape_cast %275 : vector<8xf32> to vector<8x1xf32>
    %c0_93 = arith.constant 0 : index
    %c10 = arith.constant 10 : index
    %277 = vector.load %arg6[%c0_93, %c10] : memref<8x16xf32, #tpu.memory_space<vmem>>, vector<8x1xf32>
    tpu.vector_store %arg6[%c0_93, %c10], %276 {strides = array<i32>} : memref<8x16xf32, #tpu.memory_space<vmem>>, vector<8x1xf32>,
    %278 = vector.extract_strided_slice %12 {offsets = [0, 1408], sizes = [8, 128], strides = [1, 1]} : vector<8x2176xf32> to vector<8x128xf32>
    %279 = arith.addf %278, %57 : vector<8x128xf32>
    %cst_94 = arith.constant -1.000000e+30 : f32
    %280 = vector.broadcast %cst_94 : f32 to vector<8x128xf32>
    %281 = arith.select %15, %279, %280 : vector<8x128xi1>, vector<8x128xf32>
    %cst_95 = arith.constant dense<0xFF800000> : vector<8xf32>
    %282 = vector.multi_reduction <maximumf>, %281, %cst_95 [1] : vector<8x128xf32> to vector<8xf32>
    %283 = vector.shape_cast %282 : vector<8xf32> to vector<8x1xf32>
    %284 = vector.broadcast %283 : vector<8x1xf32> to vector<8x128xf32>
    %285 = arith.subf %281, %284 : vector<8x128xf32>
    %286 = math.exp %285 : vector<8x128xf32>
    %cst_96 = arith.constant dense<0.000000e+00> : vector<8xf32>
    %287 = vector.multi_reduction <add>, %286, %cst_96 [1] : vector<8x128xf32> to vector<8xf32>
    %288 = vector.shape_cast %287 : vector<8xf32> to vector<8x1xf32>
    %289 = vector.broadcast %288 : vector<8x1xf32> to vector<8x128xf32>
    %290 = arith.divf %286, %289 : vector<8x128xf32>
    %cst_97 = arith.constant 9.99999997E-7 : f32
    %291 = vector.broadcast %cst_97 : f32 to vector<8x128xf32>
    %292 = arith.addf %290, %291 : vector<8x128xf32>
    %c0_98 = arith.constant 0 : index
    %c1408 = arith.constant 1408 : index
    %293 = vector.load %arg7[%c0_98, %c1408] : memref<8x2048xf32, #tpu.memory_space<vmem>>, vector<8x128xf32>
    tpu.vector_store %arg7[%c0_98, %c1408], %292 {strides = array<i32>} : memref<8x2048xf32, #tpu.memory_space<vmem>>, vector<8x128xf32>,
    %294 = arith.mulf %292, %22 : vector<8x128xf32>
    %cst_99 = arith.constant dense<0.000000e+00> : vector<8xf32>
    %295 = vector.multi_reduction <add>, %294, %cst_99 [1] : vector<8x128xf32> to vector<8xf32>
    %296 = vector.shape_cast %295 : vector<8xf32> to vector<8x1xf32>
    %c0_100 = arith.constant 0 : index
    %c11 = arith.constant 11 : index
    %297 = vector.load %arg6[%c0_100, %c11] : memref<8x16xf32, #tpu.memory_space<vmem>>, vector<8x1xf32>
    tpu.vector_store %arg6[%c0_100, %c11], %296 {strides = array<i32>} : memref<8x16xf32, #tpu.memory_space<vmem>>, vector<8x1xf32>,
    %298 = vector.extract_strided_slice %12 {offsets = [0, 1536], sizes = [8, 128], strides = [1, 1]} : vector<8x2176xf32> to vector<8x128xf32>
    %299 = arith.addf %298, %57 : vector<8x128xf32>
    %cst_101 = arith.constant -1.000000e+30 : f32
    %300 = vector.broadcast %cst_101 : f32 to vector<8x128xf32>
    %301 = arith.select %15, %299, %300 : vector<8x128xi1>, vector<8x128xf32>
    %cst_102 = arith.constant dense<0xFF800000> : vector<8xf32>
    %302 = vector.multi_reduction <maximumf>, %301, %cst_102 [1] : vector<8x128xf32> to vector<8xf32>
    %303 = vector.shape_cast %302 : vector<8xf32> to vector<8x1xf32>
    %304 = vector.broadcast %303 : vector<8x1xf32> to vector<8x128xf32>
    %305 = arith.subf %301, %304 : vector<8x128xf32>
    %306 = math.exp %305 : vector<8x128xf32>
    %cst_103 = arith.constant dense<0.000000e+00> : vector<8xf32>
    %307 = vector.multi_reduction <add>, %306, %cst_103 [1] : vector<8x128xf32> to vector<8xf32>
    %308 = vector.shape_cast %307 : vector<8xf32> to vector<8x1xf32>
    %309 = vector.broadcast %308 : vector<8x1xf32> to vector<8x128xf32>
    %310 = arith.divf %306, %309 : vector<8x128xf32>
    %cst_104 = arith.constant 9.99999997E-7 : f32
    %311 = vector.broadcast %cst_104 : f32 to vector<8x128xf32>
    %312 = arith.addf %310, %311 : vector<8x128xf32>
    %c0_105 = arith.constant 0 : index
    %c1536 = arith.constant 1536 : index
    %313 = vector.load %arg7[%c0_105, %c1536] : memref<8x2048xf32, #tpu.memory_space<vmem>>, vector<8x128xf32>
    tpu.vector_store %arg7[%c0_105, %c1536], %312 {strides = array<i32>} : memref<8x2048xf32, #tpu.memory_space<vmem>>, vector<8x128xf32>,
    %314 = arith.mulf %312, %22 : vector<8x128xf32>
    %cst_106 = arith.constant dense<0.000000e+00> : vector<8xf32>
    %315 = vector.multi_reduction <add>, %314, %cst_106 [1] : vector<8x128xf32> to vector<8xf32>
    %316 = vector.shape_cast %315 : vector<8xf32> to vector<8x1xf32>
    %c0_107 = arith.constant 0 : index
    %c12 = arith.constant 12 : index
    %317 = vector.load %arg6[%c0_107, %c12] : memref<8x16xf32, #tpu.memory_space<vmem>>, vector<8x1xf32>
    tpu.vector_store %arg6[%c0_107, %c12], %316 {strides = array<i32>} : memref<8x16xf32, #tpu.memory_space<vmem>>, vector<8x1xf32>,
    %318 = vector.extract_strided_slice %12 {offsets = [0, 1664], sizes = [8, 128], strides = [1, 1]} : vector<8x2176xf32> to vector<8x128xf32>
    %319 = arith.addf %318, %57 : vector<8x128xf32>
    %cst_108 = arith.constant -1.000000e+30 : f32
    %320 = vector.broadcast %cst_108 : f32 to vector<8x128xf32>
    %321 = arith.select %15, %319, %320 : vector<8x128xi1>, vector<8x128xf32>
    %cst_109 = arith.constant dense<0xFF800000> : vector<8xf32>
    %322 = vector.multi_reduction <maximumf>, %321, %cst_109 [1] : vector<8x128xf32> to vector<8xf32>
    %323 = vector.shape_cast %322 : vector<8xf32> to vector<8x1xf32>
    %324 = vector.broadcast %323 : vector<8x1xf32> to vector<8x128xf32>
    %325 = arith.subf %321, %324 : vector<8x128xf32>
    %326 = math.exp %325 : vector<8x128xf32>
    %cst_110 = arith.constant dense<0.000000e+00> : vector<8xf32>
    %327 = vector.multi_reduction <add>, %326, %cst_110 [1] : vector<8x128xf32> to vector<8xf32>
    %328 = vector.shape_cast %327 : vector<8xf32> to vector<8x1xf32>
    %329 = vector.broadcast %328 : vector<8x1xf32> to vector<8x128xf32>
    %330 = arith.divf %326, %329 : vector<8x128xf32>
    %cst_111 = arith.constant 9.99999997E-7 : f32
    %331 = vector.broadcast %cst_111 : f32 to vector<8x128xf32>
    %332 = arith.addf %330, %331 : vector<8x128xf32>
    %c0_112 = arith.constant 0 : index
    %c1664 = arith.constant 1664 : index
    %333 = vector.load %arg7[%c0_112, %c1664] : memref<8x2048xf32, #tpu.memory_space<vmem>>, vector<8x128xf32>
    tpu.vector_store %arg7[%c0_112, %c1664], %332 {strides = array<i32>} : memref<8x2048xf32, #tpu.memory_space<vmem>>, vector<8x128xf32>,
    %334 = arith.mulf %332, %22 : vector<8x128xf32>
    %cst_113 = arith.constant dense<0.000000e+00> : vector<8xf32>
    %335 = vector.multi_reduction <add>, %334, %cst_113 [1] : vector<8x128xf32> to vector<8xf32>
    %336 = vector.shape_cast %335 : vector<8xf32> to vector<8x1xf32>
    %c0_114 = arith.constant 0 : index
    %c13 = arith.constant 13 : index
    %337 = vector.load %arg6[%c0_114, %c13] : memref<8x16xf32, #tpu.memory_space<vmem>>, vector<8x1xf32>
    tpu.vector_store %arg6[%c0_114, %c13], %336 {strides = array<i32>} : memref<8x16xf32, #tpu.memory_space<vmem>>, vector<8x1xf32>,
    %338 = vector.extract_strided_slice %12 {offsets = [0, 1792], sizes = [8, 128], strides = [1, 1]} : vector<8x2176xf32> to vector<8x128xf32>
    %339 = arith.addf %338, %57 : vector<8x128xf32>
    %cst_115 = arith.constant -1.000000e+30 : f32
    %340 = vector.broadcast %cst_115 : f32 to vector<8x128xf32>
    %341 = arith.select %15, %339, %340 : vector<8x128xi1>, vector<8x128xf32>
    %cst_116 = arith.constant dense<0xFF800000> : vector<8xf32>
    %342 = vector.multi_reduction <maximumf>, %341, %cst_116 [1] : vector<8x128xf32> to vector<8xf32>
    %343 = vector.shape_cast %342 : vector<8xf32> to vector<8x1xf32>
    %344 = vector.broadcast %343 : vector<8x1xf32> to vector<8x128xf32>
    %345 = arith.subf %341, %344 : vector<8x128xf32>
    %346 = math.exp %345 : vector<8x128xf32>
    %cst_117 = arith.constant dense<0.000000e+00> : vector<8xf32>
    %347 = vector.multi_reduction <add>, %346, %cst_117 [1] : vector<8x128xf32> to vector<8xf32>
    %348 = vector.shape_cast %347 : vector<8xf32> to vector<8x1xf32>
    %349 = vector.broadcast %348 : vector<8x1xf32> to vector<8x128xf32>
    %350 = arith.divf %346, %349 : vector<8x128xf32>
    %cst_118 = arith.constant 9.99999997E-7 : f32
    %351 = vector.broadcast %cst_118 : f32 to vector<8x128xf32>
    %352 = arith.addf %350, %351 : vector<8x128xf32>
    %c0_119 = arith.constant 0 : index
    %c1792 = arith.constant 1792 : index
    %353 = vector.load %arg7[%c0_119, %c1792] : memref<8x2048xf32, #tpu.memory_space<vmem>>, vector<8x128xf32>
    tpu.vector_store %arg7[%c0_119, %c1792], %352 {strides = array<i32>} : memref<8x2048xf32, #tpu.memory_space<vmem>>, vector<8x128xf32>,
    %354 = arith.mulf %352, %22 : vector<8x128xf32>
    %cst_120 = arith.constant dense<0.000000e+00> : vector<8xf32>
    %355 = vector.multi_reduction <add>, %354, %cst_120 [1] : vector<8x128xf32> to vector<8xf32>
    %356 = vector.shape_cast %355 : vector<8xf32> to vector<8x1xf32>
    %c0_121 = arith.constant 0 : index
    %c14 = arith.constant 14 : index
    %357 = vector.load %arg6[%c0_121, %c14] : memref<8x16xf32, #tpu.memory_space<vmem>>, vector<8x1xf32>
    tpu.vector_store %arg6[%c0_121, %c14], %356 {strides = array<i32>} : memref<8x16xf32, #tpu.memory_space<vmem>>, vector<8x1xf32>,
    %358 = vector.extract_strided_slice %12 {offsets = [0, 1920], sizes = [8, 128], strides = [1, 1]} : vector<8x2176xf32> to vector<8x128xf32>
    %359 = arith.addf %358, %57 : vector<8x128xf32>
    %cst_122 = arith.constant -1.000000e+30 : f32
    %360 = vector.broadcast %cst_122 : f32 to vector<8x128xf32>
    %361 = arith.select %15, %359, %360 : vector<8x128xi1>, vector<8x128xf32>
    %cst_123 = arith.constant dense<0xFF800000> : vector<8xf32>
    %362 = vector.multi_reduction <maximumf>, %361, %cst_123 [1] : vector<8x128xf32> to vector<8xf32>
    %363 = vector.shape_cast %362 : vector<8xf32> to vector<8x1xf32>
    %364 = vector.broadcast %363 : vector<8x1xf32> to vector<8x128xf32>
    %365 = arith.subf %361, %364 : vector<8x128xf32>
    %366 = math.exp %365 : vector<8x128xf32>
    %cst_124 = arith.constant dense<0.000000e+00> : vector<8xf32>
    %367 = vector.multi_reduction <add>, %366, %cst_124 [1] : vector<8x128xf32> to vector<8xf32>
    %368 = vector.shape_cast %367 : vector<8xf32> to vector<8x1xf32>
    %369 = vector.broadcast %368 : vector<8x1xf32> to vector<8x128xf32>
    %370 = arith.divf %366, %369 : vector<8x128xf32>
    %cst_125 = arith.constant 9.99999997E-7 : f32
    %371 = vector.broadcast %cst_125 : f32 to vector<8x128xf32>
    %372 = arith.addf %370, %371 : vector<8x128xf32>
    %c0_126 = arith.constant 0 : index
    %c1920 = arith.constant 1920 : index
    %373 = vector.load %arg7[%c0_126, %c1920] : memref<8x2048xf32, #tpu.memory_space<vmem>>, vector<8x128xf32>
    tpu.vector_store %arg7[%c0_126, %c1920], %372 {strides = array<i32>} : memref<8x2048xf32, #tpu.memory_space<vmem>>, vector<8x128xf32>,
    %374 = arith.mulf %372, %22 : vector<8x128xf32>
    %cst_127 = arith.constant dense<0.000000e+00> : vector<8xf32>
    %375 = vector.multi_reduction <add>, %374, %cst_127 [1] : vector<8x128xf32> to vector<8xf32>
    %376 = vector.shape_cast %375 : vector<8xf32> to vector<8x1xf32>
    %c0_128 = arith.constant 0 : index
    %c15 = arith.constant 15 : index
    %377 = vector.load %arg6[%c0_128, %c15] : memref<8x16xf32, #tpu.memory_space<vmem>>, vector<8x1xf32>
    tpu.vector_store %arg6[%c0_128, %c15], %376 {strides = array<i32>} : memref<8x16xf32, #tpu.memory_space<vmem>>, vector<8x1xf32>,
    return
  }
  func.func @transform_0(%arg0: i32) -> (i32, i32) {
    %c0_i32 = arith.constant 0 : i32
    %c0_i32_0 = arith.constant 0 : i32
    return %arg0, %c0_i32 : i32, i32
  }
  func.func @transform_1(%arg0: i32) -> (i32, i32) {
    %c0_i32 = arith.constant 0 : i32
    %c0_i32_0 = arith.constant 0 : i32
    %c0_i32_1 = arith.constant 0 : i32
    return %c0_i32, %c0_i32_0 : i32, i32
  }
  func.func @transform_2(%arg0: i32) -> (i32, i32) {
    %c0_i32 = arith.constant 0 : i32
    %c0_i32_0 = arith.constant 0 : i32
    %c0_i32_1 = arith.constant 0 : i32
    return %c0_i32, %c0_i32_0 : i32, i32
  }
  func.func @transform_3(%arg0: i32) -> (i32, i32) {
    %c0_i32 = arith.constant 0 : i32
    %c0_i32_0 = arith.constant 0 : i32
    %c0_i32_1 = arith.constant 0 : i32
    return %c0_i32, %c0_i32_0 : i32, i32
  }
  func.func @transform_4(%arg0: i32) -> (i32, i32) {
    %c0_i32 = arith.constant 0 : i32
    %c0_i32_0 = arith.constant 0 : i32
    %c0_i32_1 = arith.constant 0 : i32
    return %c0_i32, %c0_i32_0 : i32, i32
  }
  func.func @transform_5(%arg0: i32) -> (i32, i32) {
    %c0_i32 = arith.constant 0 : i32
    %c0_i32_0 = arith.constant 0 : i32
    return %arg0, %c0_i32 : i32, i32
  }
  func.func @transform_6(%arg0: i32) -> (i32, i32) {
    %c0_i32 = arith.constant 0 : i32
    %c0_i32_0 = arith.constant 0 : i32
    return %arg0, %c0_i32 : i32, i32
  }
}

</mosaic_0001>

<bundles_post_ra>
// kernel: tpu_custom_call.1
= control target key start
LH: loop header
LB: loop body
LE: loop exit
PB: predicated region body
PF: predicated region fallthrough
CT: control target
= control target key end

     0   :  { %12 = vsyncpa [#allocation3], 0  ;;  %s1928_s0 = inlined_call_operand.hbm [shape: f32[8,32], index: 0, kind: input, shape index: {}]   ;;  %s1929_s1 = inlined_call_operand.hbm [shape: f32[32,64], index: 1, kind: input, shape index: {}]   ;;  %s1930_s2 = inlined_call_operand.vmem [shape: f32[1,64], index: 2, kind: input, shape index: {}]   ;;  %s1931_s3 = inlined_call_operand.hbm [shape: f32[64,2176], index: 3, kind: input, shape index: {}]   ;;  %s1932_s4 = inlined_call_operand.hbm [shape: f32[1,2176], index: 4, kind: input, shape index: {}]   ;;  %s1933_s5 = inlined_call_operand.hbm [shape: f32[8,16], index: 5, kind: output, shape index: {0}]   ;;  %s1934_s6 = inlined_call_operand.hbm [shape: f32[8,2048], index: 6, kind: output, shape index: {1}]  }
   0x1   :  { %13 = vsyncpa [#allocation6], 0 }
   0x2   :  { %14 = vsyncpa [#allocation9], 0 }
   0x3   :  { %15 = vsyncpa [#allocation4], 0 }
   0x4   :  { %16 = vsyncpa [#allocation12], 0  ;;  %s1636_s21 = smov [#allocation5]  }
   0x5   :  { %s32_s22 = sshll.u32 %s1636_s21, 4  ;;  %s33_s22 = int_to_ptr.vmem [resolvable:$true] %s32_s22 }
   0x6   :  { %s1514_s23 = scalar_lea.vmem %s33_s22, 512  ;;  %p1519_p1 = scmp.lt.s32.totalorder %s33_s22, %s33_s22 }
   0x7   :  { %p1515_p0 = scmp.ne.s32.totalorder %s33_s22, %s1514_s23  ;;  %p1520_p2 = scmp.lt.s32.totalorder %s1514_s23, %s1514_s23 }
   0x9   :  { %p1521_p3 = por %p1520_p2, %p1519_p1 }
   0xb   :  { %p1522_p4 = pnand %p1521_p3, %p1515_p0 }
   0xd   :  { %1525 = shalt.err (!%p1522_p4)
}
   0xe   :  { %s1637_s24 = smov 128   ;;  %s1638_s25 = smov 8  }
   0xf   :  { %38 = dma.hbm_to_vmem [thread:$0]  %s1929_s1, 512, %s33_s22, [#allocation6], %s1637_s24, %s1637_s24, %s1638_s25  }
  0x10   :  { %s1639_s28 = smov [#allocation2]   ;;  %s1640_s30 = smov [#allocation7]  }
  0x11   :  { %s23_s29 = sshll.u32 %s1639_s28, 4  ;;  %s46_s7 = sshll.u32 %s1640_s30, 4  ;;  %s24_s29 = int_to_ptr.vmem [resolvable:$true] %s23_s29  ;;  %s47_s7 = int_to_ptr.vmem [resolvable:$true] %s46_s7 }
  0x12   :  { %s1534_s8 = scalar_lea.vmem %s24_s29, 128  ;;  %p1539_p6 = scmp.lt.s32.totalorder %s24_s29, %s24_s29 }
  0x13   :  { %p1535_p5 = scmp.ne.s32.totalorder %s24_s29, %s1534_s8  ;;  %p1540_p7 = scmp.lt.s32.totalorder %s1534_s8, %s1534_s8 }
  0x15   :  { %p1541_p8 = por %p1540_p7, %p1539_p6 }
  0x17   :  { %p1542_p9 = pnand %p1541_p8, %p1535_p5 }
  0x19   :  { %1545 = shalt.err (!%p1542_p9)
}
  0x1a   :  { %26 = dma.hbm_to_vmem [thread:$0]  %s1928_s0, 128, %s24_s29, [#allocation3]  }
  0x1b   :  { %s1554_s11 = scalar_lea.vmem %s47_s7, 17408  ;;  %p1559_p11 = scmp.lt.s32.totalorder %s47_s7, %s47_s7 }
  0x1c   :  { %p1555_p10 = scmp.ne.s32.totalorder %s47_s7, %s1554_s11  ;;  %p1560_p12 = scmp.lt.s32.totalorder %s1554_s11, %s1554_s11 }
  0x1e   :  { %p1561_p13 = por %p1560_p12, %p1559_p11 }
  0x20   :  { %p1562_p0 = pnand %p1561_p13, %p1555_p10 }
  0x22   :  { %1565 = shalt.err (!%p1562_p0)
}
  0x23   :  { %s1641_s1 = smov 2176   ;;  %s1642_s12 = smov 136  }
  0x24   :  { %52 = dma.hbm_to_vmem [thread:$0]  %s1931_s3, 17408, %s47_s7, [#allocation6], %s1641_s1, %s1641_s1, %s1642_s12  }
  0x25   :  { %s1643_s15 = smov [#allocation8]  }
  0x26   :  { %s59_s16 = sshll.u32 %s1643_s15, 4  ;;  %s60_s16 = int_to_ptr.vmem [resolvable:$true] %s59_s16 }
  0x27   :  { %s1574_s17 = scalar_lea.vmem %s60_s16, 272  ;;  %s1578_s0 = scalar_lea.vmem %s60_s16, 288 }
  0x28   :  { %p1575_p1 = scmp.ne.s32.totalorder %s60_s16, %s1574_s17  ;;  %p1579_p2 = scmp.lt.s32.totalorder %s60_s16, %s60_s16 }
  0x29   :  { %p1580_p3 = scmp.lt.s32.totalorder %s1578_s0, %s1574_s17 }
  0x2b   :  { %p1581_p4 = por %p1580_p3, %p1579_p2 }
  0x2d   :  { %p1582_p5 = pnand %p1581_p4, %p1575_p1 }
  0x2f   :  { %1585 = shalt.err (!%p1582_p5)
}
  0x30   :  { %62 = dma.hbm_to_vmem [thread:$0]  %s1932_s4, 272, %s60_s16, [#allocation9]  }
  0x31   :  { %1626 = dma.done.wait [#allocation3], 128  }
  0x32   :  { %1627 = vsyncadd [#allocation3], 4294967168 }
  0x33   :  { %1628 = dma.done.wait [#allocation6], 17920  }
  0x34   :  { %1629 = vsyncadd [#allocation6], 4294949376 }
  0x35   :  { %1630 = dma.done.wait [#allocation9], 272  }
  0x36   :  { %1631 = vsyncadd [#allocation9], 4294967024  ;;  %v1644_v0 = vmov 0.0   ;;  %vm1645_vm0 = vmmov 0   ;;  %v79_v1 = vld [vmem:[#allocation5 + $0x18] sm:$0xff]  ;;  %v78_v2 = vld [vmem:[#allocation5 + $0x10] sm:$0xff] }
  0x37   :  { %1400 = vmatprep.subr.mxu0 %v1644_v0  ;;  %1408 = vmatprep.mubr.msk.f32.mxu0 %vm1645_vm0, %v1644_v0  ;;  %v282_v3 = vld [vmem:[#allocation7 + $0x3c0] sm:$0xff]  ;;  %v77_v4 = vld [vmem:[#allocation5 + $0x8] sm:$0xff]  ;;  %v281_v5 = vld [vmem:[#allocation7 + $0x3b8] sm:$0xff]  ;;  %vm87_vm1 = vcmask 261120   ;;  %vm389_vm2 = vcmask 523264  }
  0x38   :  { %457 = vmatprep.mubr.f32.mxu1 %v1644_v0  ;;  %1401 = vmatpush3.msra.mxu0 %v79_v1  ;;  %v265_v6 = vld [vmem:[#allocation7 + $0x338] sm:$0xff]  ;;  %v264_v7 = vld [vmem:[#allocation7 + $0x330] sm:$0xff]  ;;  %v76_v8 = vld [vmem:[#allocation5] sm:$0xff] }
  0x39   :  { %1402 = vmatprep.subr.mxu0 %v1644_v0  ;;  %409 = vmatprep.subr.mxu1 %v282_v3  ;;  %v248_v9 = vld [vmem:[#allocation7 + $0x2b0] sm:$0xff]  ;;  %v75_v10 = vld [vmem:[#allocation2] sm:$0xff]  ;;  %v247_v12 = vld [vmem:[#allocation7 + $0x2a8] sm:$0xff] }
  0x3a   :  { %1403 = vmatpush3.msra.mxu0 %v78_v2  ;;  %410 = vmatpush1.msra.mxu1 %v281_v5  ;;  %v284_v11 = vld [vmem:[#allocation7 + $0x3d0] sm:$0xff]  ;;  %v283_v13 = vld [vmem:[#allocation7 + $0x3c8] sm:$0xff]  ;;  %v230_v16 = vld [vmem:[#allocation7 + $0x220] sm:$0xff] }
  0x3b   :  { %1404 = vmatprep.subr.mxu0 %v1644_v0  ;;  %411 = vmatprep.subr.mxu1 %v265_v6  ;;  %v231_v14 = vld [vmem:[#allocation7 + $0x228] sm:$0xff]  ;;  %v266_v17 = vld [vmem:[#allocation7 + $0x340] sm:$0xff]  ;;  %v213_v20 = vld [vmem:[#allocation7 + $0x198] sm:$0xff] }
  0x3c   :  { %1405 = vmatpush3.msra.mxu0 %v77_v4  ;;  %412 = vmatpush1.msra.mxu1 %v264_v7  ;;  %v267_v15 = vld [vmem:[#allocation7 + $0x348] sm:$0xff]  ;;  %v214_v18 = vld [vmem:[#allocation7 + $0x1a0] sm:$0xff]  ;;  %v249_v21 = vld [vmem:[#allocation7 + $0x2b8] sm:$0xff] }
  0x3d   :  { %1406 = vmatprep.subr.mxu0 %v1644_v0  ;;  %413 = vmatprep.subr.mxu1 %v248_v9  ;;  %v250_v19 = vld [vmem:[#allocation7 + $0x2c0] sm:$0xff]  ;;  %v197_v22 = vld [vmem:[#allocation7 + $0x118] sm:$0xff]  ;;  %v196_v24 = vld [vmem:[#allocation7 + $0x110] sm:$0xff] }
  0x3e   :  { %1407 = vmatpush3.msra.mxu0 %v76_v8  ;;  %414 = vmatpush1.msra.mxu1 %v247_v12  ;;  %v233_v23 = vld [vmem:[#allocation7 + $0x238] sm:$0xff]  ;;  %v232_v25 = vld [vmem:[#allocation7 + $0x230] sm:$0xff]  ;;  %v215_v27 = vld [vmem:[#allocation7 + $0x1a8] sm:$0xff] }
  0x3f   :  { %1409 = vmatmul.mubr.msk.f32.vlgmr.msra.gmra.mxu0 %vm87_vm1, %v75_v10  ;;  %480 = vmatprep.subr.mxu0 %v284_v11  ;;  %v216_v26 = vld [vmem:[#allocation7 + $0x1b0] sm:$0xff]  ;;  %v199_v28 = vld [vmem:[#allocation7 + $0x128] sm:$0xff]  ;;  %v198_v29 = vld [vmem:[#allocation7 + $0x120] sm:$0xff] }
  0x40   :  { %481 = vmatpush1.msra.mxu0 %v283_v13  ;;  %415 = vmatprep.subr.mxu1 %v231_v14  ;;  %v180_v30 = vld [vmem:[#allocation7 + $0x90] sm:$0xff]  ;;  %v182_v31 = vld [vmem:[#allocation7 + $0xa0] sm:$0xff]  ;;  %v179_v32 = vld [vmem:[#allocation7 + $0x88] sm:$0xff] }
  0x41   :  { %482 = vmatprep.subr.mxu0 %v267_v15  ;;  %416 = vmatpush1.msra.mxu1 %v230_v16  ;;  %v181_v33 = vld [vmem:[#allocation7 + $0x98] sm:$0xff]  ;;  %v163_v34 = vld [vmem:[#allocation7 + $0x8] sm:$0xff]  ;;  %v162_v36 = vld [vmem:[#allocation7] sm:$0xff] }
  0x42   :  { %483 = vmatpush1.msra.mxu0 %v266_v17  ;;  %417 = vmatprep.subr.mxu1 %v214_v18  ;;  %v165_v35 = vld [vmem:[#allocation7 + $0x18] sm:$0xff]  ;;  %v164_v37 = vld [vmem:[#allocation7 + $0x10] sm:$0xff]  ;;  %v286_v38 = vld [vmem:[#allocation7 + $0x3e0] sm:$0xff] }
  0x43   :  { %484 = vmatprep.subr.mxu0 %v250_v19  ;;  %418 = vmatpush1.msra.mxu1 %v213_v20  ;;  %v288_v39 = vld [vmem:[#allocation7 + $0x3f0] sm:$0xff]  ;;  %v1374_v40 = vld [vmem:[%s1930_s2] ss:$0 sm:$0xff]  ;;  %v287_v46 = vld [vmem:[#allocation7 + $0x3e8] sm:$0xff]  ;;  %s1646_s2 = smov [#allocation11]  }
  0x44   :  { %485 = vmatpush1.msra.mxu0 %v249_v21  ;;  %419 = vmatprep.subr.mxu1 %v197_v22  ;;  %v285_v45 = vld [vmem:[#allocation7 + $0x3d8] sm:$0xff]  ;;  %v271_v48 = vld [vmem:[#allocation7 + $0x368] sm:$0xff]  ;;  %v268_v49 = vld [vmem:[#allocation7 + $0x350] sm:$0xff]  ;;  %s1359_s20 = sshll.u32 %s1646_s2, 4  ;;  %s1360_s20 = int_to_ptr.vmem [resolvable:$true] %s1359_s20 }
  0x45   :  { %486 = vmatprep.subr.mxu0 %v233_v23  ;;  %420 = vmatpush1.msra.mxu1 %v196_v24  ;;  %v269_v47 = vld [vmem:[#allocation7 + $0x358] sm:$0xff]  ;;  %v270_v50 = vld [vmem:[#allocation7 + $0x360] sm:$0xff]  ;;  %v252_v51 = vld [vmem:[#allocation7 + $0x2d0] sm:$0xff]  ;;  %s1586_s21 = scalar_lea.vmem %s1360_s20, 2048  ;;  %p1591_p7 = scmp.lt.s32.totalorder %s1360_s20, %s1360_s20 }
  0x46   :  { %487 = vmatpush1.msra.mxu0 %v232_v25  ;;  %528 = vmatprep.mubr.f32.mxu0 %v1644_v0  ;;  %v254_v52 = vld [vmem:[#allocation7 + $0x2e0] sm:$0xff]  ;;  %v251_v53 = vld [vmem:[#allocation7 + $0x2c8] sm:$0xff]  ;;  %v253_v54 = vld [vmem:[#allocation7 + $0x2d8] sm:$0xff]  ;;  %p1587_p6 = scmp.ne.s32.totalorder %s1360_s20, %s1586_s21  ;;  %p1592_p8 = scmp.lt.s32.totalorder %s1586_s21, %s1586_s21 }
  0x47   :  { %488 = vmatprep.subr.mxu0 %v216_v26  ;;  %421 = vmatprep.subr.mxu1 %v180_v30  ;;  %v235_v55 = vld [vmem:[#allocation7 + $0x248] sm:$0xff]  ;;  %v237_v56 = vld [vmem:[#allocation7 + $0x258] sm:$0xff]  ;;  %v234_v57 = vld [vmem:[#allocation7 + $0x240] sm:$0xff] }
  0x48   :  { %489 = vmatpush1.msra.mxu0 %v215_v27  ;;  %422 = vmatpush1.msra.mxu1 %v179_v32  ;;  %v236_v58 = vld [vmem:[#allocation7 + $0x250] sm:$0xff]  ;;  %v218_v59 = vld [vmem:[#allocation7 + $0x1c0] sm:$0xff]  ;;  %v217_v61 = vld [vmem:[#allocation7 + $0x1b8] sm:$0xff]  ;;  %p1593_p9 = por %p1592_p8, %p1591_p7 }
  0x49   :  { %490 = vmatprep.subr.mxu0 %v199_v28  ;;  %423 = vmatprep.subr.mxu1 %v163_v34  ;;  %v220_v60 = vld [vmem:[#allocation7 + $0x1d0] sm:$0xff]  ;;  %v219_v62 = vld [vmem:[#allocation7 + $0x1c8] sm:$0xff]  ;;  %v201_v63 = vld [vmem:[#allocation7 + $0x138] sm:$0xff] }
  0x4a   :  { %491 = vmatpush1.msra.mxu0 %v198_v29  ;;  %424 = vmatpush1.msra.mxu1 %v162_v36  ;;  %v203_v1 = vld [vmem:[#allocation7 + $0x148] sm:$0xff]  ;;  %v200_v2 = vld [vmem:[#allocation7 + $0x130] sm:$0xff]  ;;  %v202_v3 = vld [vmem:[#allocation7 + $0x140] sm:$0xff]  ;;  %p1594_p10 = pnand %p1593_p9, %p1587_p6 }
  0x4b   :  { %492 = vmatprep.subr.mxu0 %v182_v31  ;;  %551 = vmatprep.subr.mxu1 %v286_v38  ;;  %v184_v4 = vld [vmem:[#allocation7 + $0xb0] sm:$0xff]  ;;  %v186_v5 = vld [vmem:[#allocation7 + $0xc0] sm:$0xff]  ;;  %v183_v6 = vld [vmem:[#allocation7 + $0xa8] sm:$0xff] }
  0x4c   :  { %493 = vmatpush1.msra.mxu0 %v181_v33  ;;  %v185_v7 = vld [vmem:[#allocation7 + $0xb8] sm:$0xff]  ;;  %v167_v8 = vld [vmem:[#allocation7 + $0x28] sm:$0xff]  ;;  %v166_v10 = vld [vmem:[#allocation7 + $0x20] sm:$0xff] }
  0x4d   :  { %494 = vmatprep.subr.mxu0 %v165_v35  ;;  %v169_v9 = vld [vmem:[#allocation7 + $0x38] sm:$0xff]  ;;  %v168_v11 = vld [vmem:[#allocation7 + $0x30] sm:$0xff]  ;;  %v290_v12 = vld [vmem:[#allocation7 + $0x400] sm:$0xff] }
  0x4e   :  { %495 = vmatpush1.msra.mxu0 %v164_v37  ;;  %v292_v13 = vld [vmem:[#allocation7 + $0x410] sm:$0xff]  ;;  %v289_v14 = vld [vmem:[#allocation7 + $0x3f8] sm:$0xff]  ;;  %v291_v15 = vld [vmem:[#allocation7 + $0x408] sm:$0xff] }
  0x4f   :  { %622 = vmatprep.subr.mxu0 %v288_v39  ;;  %v273_v16 = vld [vmem:[#allocation7 + $0x378] sm:$0xff]  ;;  %v275_v17 = vld [vmem:[#allocation7 + $0x388] sm:$0xff]  ;;  %v272_v18 = vld [vmem:[#allocation7 + $0x370] sm:$0xff] }
  0x50   :  { %v274_v19 = vld [vmem:[#allocation7 + $0x380] sm:$0xff]  ;;  %v256_v20 = vld [vmem:[#allocation7 + $0x2f0] sm:$0xff]  ;;  %v255_v22 = vld [vmem:[#allocation7 + $0x2e8] sm:$0xff] }
  0x51   :  { %v258_v21 = vld [vmem:[#allocation7 + $0x300] sm:$0xff]  ;;  %v257_v23 = vld [vmem:[#allocation7 + $0x2f8] sm:$0xff]  ;;  %v239_v24 = vld [vmem:[#allocation7 + $0x268] sm:$0xff] }
  0x52   :  { %v241_v25 = vld [vmem:[#allocation7 + $0x278] sm:$0xff]  ;;  %v238_v26 = vld [vmem:[#allocation7 + $0x260] sm:$0xff]  ;;  %v240_v27 = vld [vmem:[#allocation7 + $0x270] sm:$0xff] }
  0x53   :  { %v222_v28 = vld [vmem:[#allocation7 + $0x1e0] sm:$0xff]  ;;  %v224_v29 = vld [vmem:[#allocation7 + $0x1f0] sm:$0xff]  ;;  %v221_v30 = vld [vmem:[#allocation7 + $0x1d8] sm:$0xff] }
  0x54   :  { %v223_v31 = vld [vmem:[#allocation7 + $0x1e8] sm:$0xff]  ;;  %v205_v32 = vld [vmem:[#allocation7 + $0x158] sm:$0xff]  ;;  %v204_v34 = vld [vmem:[#allocation7 + $0x150] sm:$0xff] }
  0x55   :  { %v207_v33 = vld [vmem:[#allocation7 + $0x168] sm:$0xff]  ;;  %v206_v35 = vld [vmem:[#allocation7 + $0x160] sm:$0xff]  ;;  %v188_v36 = vld [vmem:[#allocation7 + $0xd0] sm:$0xff] }
  0x56   :  { %v190_v37 = vld [vmem:[#allocation7 + $0xe0] sm:$0xff]  ;;  %v187_v38 = vld [vmem:[#allocation7 + $0xc8] sm:$0xff]  ;;  %v189_v39 = vld [vmem:[#allocation7 + $0xd8] sm:$0xff] }
  0xff   :  { %v157_v41 = vpop.f32.mrf.mxu0 }
 0x100   :  { %v158_v42 = vadd.f32 %v1374_v40, %v157_v41  ;;  %v171_v40 = vld [vmem:[#allocation7 + $0x48] sm:$0xff]  ;;  %v173_v41 = vld [vmem:[#allocation7 + $0x58] sm:$0xff] }
 0x101   :  { %v1410_v43 = vpop.f32.mrf.mxu0 }
 0x102   :  { %v1706_v44 = vmax.f32 %v158_v42, 0.0  ;;  %v170_v42 = vld [vmem:[#allocation7 + $0x40] sm:$0xff]  ;;  %v172_v43 = vld [vmem:[#allocation7 + $0x50] sm:$0xff] }
 0x104   :  { %1377 = vmatmul.mubr.msk.f32.vlgmr.msra.gmra.mxu1 %vm389_vm2, %v1706_v44  ;;  %1378 = vmatmul.mubr.msk.f32.vlgmr.msra.gmra.mxu0 %vm389_vm2, %v1706_v44 }
 0x105   :  { %552 = vmatpush1.msra.mxu1 %v285_v45  ;;  %623 = vmatpush1.msra.mxu0 %v287_v46  ;;  %v294_v45 = vld [vmem:[#allocation7 + $0x420] sm:$0xff]  ;;  %v296_v46 = vld [vmem:[#allocation7 + $0x430] sm:$0xff] }
 0x106   :  { %553 = vmatprep.subr.mxu1 %v269_v47  ;;  %624 = vmatprep.subr.mxu0 %v271_v48  ;;  %v293_v47 = vld [vmem:[#allocation7 + $0x418] sm:$0xff]  ;;  %v295_v48 = vld [vmem:[#allocation7 + $0x428] sm:$0xff] }
 0x107   :  { %554 = vmatpush1.msra.mxu1 %v268_v49  ;;  %625 = vmatpush1.msra.mxu0 %v270_v50  ;;  %v277_v49 = vld [vmem:[#allocation7 + $0x398] sm:$0xff]  ;;  %v279_v50 = vld [vmem:[#allocation7 + $0x3a8] sm:$0xff] }
 0x108   :  { %555 = vmatprep.subr.mxu1 %v252_v51  ;;  %626 = vmatprep.subr.mxu0 %v254_v52  ;;  %v276_v51 = vld [vmem:[#allocation7 + $0x390] sm:$0xff]  ;;  %v278_v52 = vld [vmem:[#allocation7 + $0x3a0] sm:$0xff] }
 0x109   :  { %556 = vmatpush1.msra.mxu1 %v251_v53  ;;  %627 = vmatpush1.msra.mxu0 %v253_v54  ;;  %v260_v53 = vld [vmem:[#allocation7 + $0x310] sm:$0xff]  ;;  %v262_v54 = vld [vmem:[#allocation7 + $0x320] sm:$0xff] }
 0x10a   :  { %557 = vmatprep.subr.mxu1 %v235_v55  ;;  %628 = vmatprep.subr.mxu0 %v237_v56  ;;  %v259_v55 = vld [vmem:[#allocation7 + $0x308] sm:$0xff]  ;;  %v261_v56 = vld [vmem:[#allocation7 + $0x318] sm:$0xff] }
 0x10b   :  { %558 = vmatpush1.msra.mxu1 %v234_v57  ;;  %629 = vmatpush1.msra.mxu0 %v236_v58  ;;  %v243_v57 = vld [vmem:[#allocation7 + $0x288] sm:$0xff]  ;;  %v245_v58 = vld [vmem:[#allocation7 + $0x298] sm:$0xff] }
 0x10c   :  { %559 = vmatprep.subr.mxu1 %v218_v59  ;;  %630 = vmatprep.subr.mxu0 %v220_v60  ;;  %v242_v59 = vld [vmem:[#allocation7 + $0x280] sm:$0xff]  ;;  %v244_v60 = vld [vmem:[#allocation7 + $0x290] sm:$0xff] }
 0x10d   :  { %560 = vmatpush1.msra.mxu1 %v217_v61  ;;  %631 = vmatpush1.msra.mxu0 %v219_v62  ;;  %v226_v61 = vld [vmem:[#allocation7 + $0x200] sm:$0xff]  ;;  %v228_v62 = vld [vmem:[#allocation7 + $0x210] sm:$0xff] }
 0x10e   :  { %561 = vmatprep.subr.mxu1 %v201_v63  ;;  %632 = vmatprep.subr.mxu0 %v203_v1  ;;  %v225_v63 = vld [vmem:[#allocation7 + $0x1f8] sm:$0xff]  ;;  %v227_v1 = vld [vmem:[#allocation7 + $0x208] sm:$0xff] }
 0x10f   :  { %562 = vmatpush1.msra.mxu1 %v200_v2  ;;  %633 = vmatpush1.msra.mxu0 %v202_v3  ;;  %v209_v2 = vld [vmem:[#allocation7 + $0x178] sm:$0xff]  ;;  %v211_v3 = vld [vmem:[#allocation7 + $0x188] sm:$0xff] }
 0x110   :  { %563 = vmatprep.subr.mxu1 %v184_v4  ;;  %634 = vmatprep.subr.mxu0 %v186_v5  ;;  %v208_v4 = vld [vmem:[#allocation7 + $0x170] sm:$0xff]  ;;  %v210_v5 = vld [vmem:[#allocation7 + $0x180] sm:$0xff] }
 0x111   :  { %564 = vmatpush1.msra.mxu1 %v183_v6  ;;  %635 = vmatpush1.msra.mxu0 %v185_v7  ;;  %v192_v6 = vld [vmem:[#allocation7 + $0xf0] sm:$0xff]  ;;  %v194_v7 = vld [vmem:[#allocation7 + $0x100] sm:$0xff] }
 0x112   :  { %565 = vmatprep.subr.mxu1 %v167_v8  ;;  %636 = vmatprep.subr.mxu0 %v169_v9  ;;  %v191_v8 = vld [vmem:[#allocation7 + $0xe8] sm:$0xff]  ;;  %v193_v9 = vld [vmem:[#allocation7 + $0xf8] sm:$0xff] }
 0x113   :  { %566 = vmatpush1.msra.mxu1 %v166_v10  ;;  %599 = vmatprep.mubr.f32.mxu1 %v1644_v0  ;;  %v175_v10 = vld [vmem:[#allocation7 + $0x68] sm:$0xff] }
 0x114   :  { %637 = vmatpush1.msra.mxu0 %v168_v11  ;;  %670 = vmatprep.mubr.f32.mxu0 %v1644_v0  ;;  %v177_v11 = vld [vmem:[#allocation7 + $0x78] sm:$0xff] }
 0x115   :  { %1379 = vmatmul.mubr.msk.f32.vlgmr.msra.gmra.mxu1 %vm389_vm2, %v1706_v44  ;;  %1380 = vmatmul.mubr.msk.f32.vlgmr.msra.gmra.mxu0 %vm389_vm2, %v1706_v44 }
 0x116   :  { %693 = vmatprep.subr.mxu1 %v290_v12  ;;  %764 = vmatprep.subr.mxu0 %v292_v13  ;;  %v174_v12 = vld [vmem:[#allocation7 + $0x60] sm:$0xff]  ;;  %v176_v13 = vld [vmem:[#allocation7 + $0x70] sm:$0xff] }
 0x117   :  { %694 = vmatpush1.msra.mxu1 %v289_v14  ;;  %765 = vmatpush1.msra.mxu0 %v291_v15  ;;  %v297_v14 = vld [vmem:[#allocation7 + $0x438] sm:$0xff]  ;;  %v280_v15 = vld [vmem:[#allocation7 + $0x3b0] sm:$0xff] }
 0x118   :  { %695 = vmatprep.subr.mxu1 %v273_v16  ;;  %766 = vmatprep.subr.mxu0 %v275_v17  ;;  %v263_v16 = vld [vmem:[#allocation7 + $0x328] sm:$0xff]  ;;  %v246_v17 = vld [vmem:[#allocation7 + $0x2a0] sm:$0xff] }
 0x119   :  { %696 = vmatpush1.msra.mxu1 %v272_v18  ;;  %767 = vmatpush1.msra.mxu0 %v274_v19  ;;  %v229_v18 = vld [vmem:[#allocation7 + $0x218] sm:$0xff]  ;;  %v212_v19 = vld [vmem:[#allocation7 + $0x190] sm:$0xff] }
 0x11a   :  { %697 = vmatprep.subr.mxu1 %v256_v20  ;;  %768 = vmatprep.subr.mxu0 %v258_v21  ;;  %v195_v20 = vld [vmem:[#allocation7 + $0x108] sm:$0xff]  ;;  %v178_v21 = vld [vmem:[#allocation7 + $0x80] sm:$0xff] }
 0x11b   :  { %698 = vmatpush1.msra.mxu1 %v255_v22  ;;  %769 = vmatpush1.msra.mxu0 %v257_v23  ;;  %v304_v22 = vlaneseq }
 0x11c   :  { %699 = vmatprep.subr.mxu1 %v239_v24  ;;  %770 = vmatprep.subr.mxu0 %v241_v25 }
 0x11d   :  { %700 = vmatpush1.msra.mxu1 %v238_v26  ;;  %771 = vmatpush1.msra.mxu0 %v240_v27  ;;  %v1743_v23 = vshrl.u32 %v304_v22, 7  ;;  %v298_v27 = vld [vmem:[#allocation8] sm:$0xff] }
 0x11e   :  { %701 = vmatprep.subr.mxu1 %v222_v28  ;;  %772 = vmatprep.subr.mxu0 %v224_v29 }
 0x11f   :  { %702 = vmatpush1.msra.mxu1 %v221_v30  ;;  %773 = vmatpush1.msra.mxu0 %v223_v31  ;;  %v310_v24 = vsub.s32 1, %v1743_v23  ;;  %v306_v26 = vsub.s32 0, %v1743_v23  ;;  %v314_v31 = vsub.s32 2, %v1743_v23 }
 0x120   :  { %703 = vmatprep.subr.mxu1 %v205_v32  ;;  %774 = vmatprep.subr.mxu0 %v207_v33  ;;  %v318_v33 = vsub.s32 3, %v1743_v23 }
 0x121   :  { %704 = vmatpush1.msra.mxu1 %v204_v34  ;;  %775 = vmatpush1.msra.mxu0 %v206_v35  ;;  %v311_v28 = vrot.slane %v298_v27, %v310_v24  ;;  %v307_v30 = vrot.slane %v298_v27, %v306_v26  ;;  %v322_v34 = vsub.s32 4, %v1743_v23 }
 0x122   :  { %705 = vmatprep.subr.mxu1 %v188_v36  ;;  %776 = vmatprep.subr.mxu0 %v190_v37 }
 0x123   :  { %706 = vmatpush1.msra.mxu1 %v187_v38  ;;  %777 = vmatpush1.msra.mxu0 %v189_v39  ;;  %v319_v38 = vrot.slane %v298_v27, %v318_v33  ;;  %v323_v39 = vrot.slane %v298_v27, %v322_v34 }
 0x124   :  { %707 = vmatprep.subr.mxu1 %v171_v40  ;;  %778 = vmatprep.subr.mxu0 %v173_v41  ;;  %v326_v40 = vsub.s32 5, %v1743_v23 }
 0x125   :  { %708 = vmatpush1.msra.mxu1 %v170_v42  ;;  %741 = vmatprep.mubr.f32.mxu1 %v1644_v0 }
 0x126   :  { %779 = vmatpush1.msra.mxu0 %v172_v43  ;;  %812 = vmatprep.mubr.f32.mxu0 %v1644_v0 }
 0x127   :  { %1381 = vmatmul.mubr.msk.f32.vlgmr.msra.gmra.mxu1 %vm389_vm2, %v1706_v44  ;;  %1382 = vmatmul.mubr.msk.f32.vlgmr.msra.gmra.mxu0 %vm389_vm2, %v1706_v44 }
 0x128   :  { %835 = vmatprep.subr.mxu1 %v294_v45  ;;  %906 = vmatprep.subr.mxu0 %v296_v46 }
 0x129   :  { %836 = vmatpush1.msra.mxu1 %v293_v47  ;;  %907 = vmatpush1.msra.mxu0 %v295_v48  ;;  %v327_v47 = vrot.slane %v298_v27, %v326_v40 }
 0x12a   :  { %837 = vmatprep.subr.mxu1 %v277_v49  ;;  %908 = vmatprep.subr.mxu0 %v279_v50  ;;  %v330_v50 = vsub.s32 6, %v1743_v23 }
 0x12b   :  { %838 = vmatpush1.msra.mxu1 %v276_v51  ;;  %909 = vmatpush1.msra.mxu0 %v278_v52 }
 0x12c   :  { %839 = vmatprep.subr.mxu1 %v260_v53  ;;  %910 = vmatprep.subr.mxu0 %v262_v54  ;;  %v331_v53 = vrot.slane %v298_v27, %v330_v50  ;;  %v334_v54 = vsub.s32 7, %v1743_v23 }
 0x12d   :  { %840 = vmatpush1.msra.mxu1 %v259_v55  ;;  %911 = vmatpush1.msra.mxu0 %v261_v56  ;;  %v299_v56 = vld [vmem:[#allocation8 + $0x8] sm:$0xff] }
 0x12e   :  { %841 = vmatprep.subr.mxu1 %v243_v57  ;;  %912 = vmatprep.subr.mxu0 %v245_v58 }
 0x12f   :  { %842 = vmatpush1.msra.mxu1 %v242_v59  ;;  %913 = vmatpush1.msra.mxu0 %v244_v60  ;;  %v335_v59 = vrot.slane %v298_v27, %v334_v54  ;;  %v339_v60 = vrot.slane %v299_v56, %v306_v26 }
 0x130   :  { %843 = vmatprep.subr.mxu1 %v226_v61  ;;  %914 = vmatprep.subr.mxu0 %v228_v62 }
 0x131   :  { %844 = vmatpush1.msra.mxu1 %v225_v63  ;;  %915 = vmatpush1.msra.mxu0 %v227_v1 }
 0x132   :  { %845 = vmatprep.subr.mxu1 %v209_v2  ;;  %916 = vmatprep.subr.mxu0 %v211_v3  ;;  %v343_v3 = vrot.slane %v299_v56, %v310_v24 }
 0x133   :  { %846 = vmatpush1.msra.mxu1 %v208_v4  ;;  %917 = vmatpush1.msra.mxu0 %v210_v5 }
 0x134   :  { %847 = vmatprep.subr.mxu1 %v192_v6  ;;  %918 = vmatprep.subr.mxu0 %v194_v7 }
 0x135   :  { %848 = vmatpush1.msra.mxu1 %v191_v8  ;;  %919 = vmatpush1.msra.mxu0 %v193_v9  ;;  %v347_v8 = vrot.slane %v299_v56, %v314_v31 }
 0x136   :  { %849 = vmatprep.subr.mxu1 %v175_v10  ;;  %920 = vmatprep.subr.mxu0 %v177_v11 }
 0x137   :  { %850 = vmatpush1.msra.mxu1 %v174_v12  ;;  %883 = vmatprep.mubr.f32.mxu1 %v1644_v0  ;;  %v351_v12 = vrot.slane %v299_v56, %v318_v33 }
 0x138   :  { %921 = vmatpush1.msra.mxu0 %v176_v13  ;;  %954 = vmatprep.mubr.f32.mxu0 %v1644_v0 }
 0x139   :  { %1383 = vmatmul.mubr.msk.f32.vlgmr.msra.gmra.mxu1 %vm389_vm2, %v1706_v44  ;;  %1384 = vmatmul.mubr.msk.f32.vlgmr.msra.gmra.mxu0 %vm389_vm2, %v1706_v44 }
 0x13a   :  { %1411 = vmatprep.subr.mxu1 %v1644_v0  ;;  %1427 = vmatprep.mubr.msk.f32.mxu1 %vm1645_vm0, %v1644_v0 }
 0x13b   :  { %1412 = vmatpush3.msra.mxu1 %v297_v14 }
 0x13c   :  { %1413 = vmatprep.subr.mxu1 %v1644_v0 }
 0x13d   :  { %1414 = vmatpush3.msra.mxu1 %v280_v15  ;;  %v355_v15 = vrot.slane %v299_v56, %v322_v34  ;;  %v1772_v34 = vand.u32 127, %v304_v22 }
 0x13e   :  { %1415 = vmatprep.subr.mxu1 %v1644_v0 }
 0x13f   :  { %1416 = vmatpush3.msra.mxu1 %v263_v16  ;;  %vm1033_vm3 = vcmp.lt.s32.totalorder %v1772_v34, 51 }
 0x140   :  { %1417 = vmatprep.subr.mxu1 %v1644_v0 }
 0x141   :  { %1418 = vmatpush3.msra.mxu1 %v246_v17  ;;  %v359_v17 = vrot.slane %v299_v56, %v326_v40 }
 0x142   :  { %1419 = vmatprep.subr.mxu1 %v1644_v0 }
 0x143   :  { %1420 = vmatpush3.msra.mxu1 %v229_v18 }
 0x144   :  { %1421 = vmatprep.subr.mxu1 %v1644_v0 }
 0x145   :  { %1422 = vmatpush3.msra.mxu1 %v212_v19 }
 0x146   :  { %1423 = vmatprep.subr.mxu1 %v1644_v0 }
 0x147   :  { %1424 = vmatpush3.msra.mxu1 %v195_v20 }
 0x148   :  { %1425 = vmatprep.subr.mxu1 %v1644_v0 }
 0x149   :  { %1426 = vmatpush3.msra.mxu1 %v178_v21 }
 0x14a   :  { %1428 = vmatmul.mubr.msk.f32.vlgmr.msra.gmra.mxu1 %vm389_vm2, %v1706_v44  ;;  %v315_v44 = vrot.slane %v298_v27, %v314_v31 }
 0x1c4   :  { %v459_v25 = vpop.f32.mrf.mxu1  ;;  %v530_v35 = vpop.f32.mrf.mxu0 }
 0x1c5   :  { %v1750_v32 = vadd.f32 %v459_v25, %v307_v30  ;;  %v1756_v37 = vadd.f32 %v530_v35, %v315_v44  ;;  %v363_v25 = vrot.slane %v299_v56, %v330_v50  ;;  %v1376_v35 = vld [vmem:[#allocation8 + $0x10] ss:$0 sm:$0xff] }
 0x1c6   :  { %v461_v29 = vpop.f32.mrf.mxu1  ;;  %v532_v41 = vpop.f32.mrf.mxu0 }
 0x1c7   :  { %v1748_v0 = vadd.f32 %v461_v29, %v311_v28  ;;  %v1760_v45 = vadd.f32 %v532_v41, %v319_v38  ;;  %v367_v29 = vrot.slane %v299_v56, %v334_v54 }
 0x1c9   :  { %v1038_v36 = vadd.f32 %v1748_v0, %v1750_v32 }
 0x1cb   :  { %v1039_v43 = vadd.f32 %v1038_v36, %v1756_v37 }
 0x1cd   :  { %v1040_v49 = vadd.f32 %v1039_v43, %v1760_v45 }
 0x1d5   :  { %v601_v42 = vpop.f32.mrf.mxu1  ;;  %v672_v55 = vpop.f32.mrf.mxu0 }
 0x1d6   :  { %v1762_v46 = vadd.f32 %v601_v42, %v323_v39  ;;  %v1768_v58 = vadd.f32 %v672_v55, %v331_v53 }
 0x1d7   :  { %v603_v48 = vpop.f32.mrf.mxu1  ;;  %v674_v61 = vpop.f32.mrf.mxu0 }
 0x1d8   :  { %v1041_v51 = vadd.f32 %v1040_v49, %v1762_v46  ;;  %v604_v52 = vadd.f32 %v603_v48, %v327_v47  ;;  %v675_v1 = vadd.f32 %v674_v61, %v335_v59 }
 0x1da   :  { %v1042_v57 = vadd.f32 %v1041_v51, %v604_v52 }
 0x1dc   :  { %v1043_v63 = vadd.f32 %v1042_v57, %v1768_v58 }
 0x1de   :  { %v1044_v5 = vadd.f32 %v1043_v63, %v675_v1 }
 0x1e7   :  { %v743_v62 = vpop.f32.mrf.mxu1  ;;  %v814_v9 = vpop.f32.mrf.mxu0 }
 0x1e8   :  { %v744_v2 = vadd.f32 %v743_v62, %v339_v60  ;;  %v815_v11 = vadd.f32 %v814_v9, %v347_v8 }
 0x1e9   :  { %v745_v4 = vpop.f32.mrf.mxu1  ;;  %v816_v13 = vpop.f32.mrf.mxu0 }
 0x1ea   :  { %v1045_v6 = vadd.f32 %v1044_v5, %v744_v2  ;;  %v746_v7 = vadd.f32 %v745_v4, %v343_v3  ;;  %v817_v16 = vadd.f32 %v816_v13, %v351_v12 }
 0x1ec   :  { %v1046_v10 = vadd.f32 %v1045_v6, %v746_v7 }
 0x1ee   :  { %v1047_v14 = vadd.f32 %v1046_v10, %v815_v11 }
 0x1f0   :  { %v1048_v19 = vadd.f32 %v1047_v14, %v817_v16 }
 0x1f9   :  { %v885_v18 = vpop.f32.mrf.mxu1  ;;  %v956_v26 = vpop.f32.mrf.mxu0 }
 0x1fa   :  { %v886_v20 = vadd.f32 %v885_v18, %v355_v15  ;;  %v957_v28 = vadd.f32 %v956_v26, %v363_v25 }
 0x1fb   :  { %v887_v21 = vpop.f32.mrf.mxu1  ;;  %v958_v30 = vpop.f32.mrf.mxu0 }
 0x1fc   :  { %v1049_v23 = vadd.f32 %v1048_v19, %v886_v20  ;;  %v888_v24 = vadd.f32 %v887_v21, %v359_v17  ;;  %v959_v44 = vadd.f32 %v958_v30, %v367_v29 }
 0x1fe   :  { %v1050_v27 = vadd.f32 %v1049_v23, %v888_v24 }
 0x200   :  { %v1051_v31 = vadd.f32 %v1050_v27, %v957_v28 }
 0x202   :  { %v1052_v33 = vadd.f32 %v1051_v31, %v959_v44 }
 0x204   :  { %v1053_v38 = vmul.f32 0.0625, %v1052_v33 }
 0x20a   :  { %v1027_v36 = vpop.f32.mrf.mxu1 }
 0x20b   :  { %v1028_v39 = vadd.f32 %v1376_v35, %v1027_v36 }
 0x20c   :  { %v1429_v40 = vpop.f32.mrf.mxu1 }
 0x20d   :  { %v1054_v41 = vsub.f32 %v1028_v39, %v1053_v38 }
 0x20f   :  { %v1091_v42 = vadd.f32 %v1054_v41, %v1756_v37  ;;  %v1055_v43 = vadd.f32 %v1054_v41, %v1750_v32  ;;  %v1109_v22 = vadd.f32 %v1054_v41, %v1760_v45  ;;  %v1073_v49 = vadd.f32 %v1054_v41, %v1748_v0 }
 0x210   :  { %v1145_v51 = vadd.f32 %v1054_v41, %v604_v52  ;;  %v1127_v32 = vadd.f32 %v1054_v41, %v1762_v46  ;;  %v1181_v0 = vadd.f32 %v1054_v41, %v675_v1  ;;  %v1163_v54 = vadd.f32 %v1054_v41, %v1768_v58 }
 0x211   :  { %v1092_v47 = vsel %vm1033_vm3, %v1091_v42, -1e+30  ;;  %v1056_v48 = vsel %vm1033_vm3, %v1055_v43, -1e+30  ;;  %v1110_v50 = vsel %vm1033_vm3, %v1109_v22, -1e+30  ;;  %v1217_v46 = vadd.f32 %v1054_v41, %v746_v7 }
 0x212   :  { %1093 = vmax.xlane.f32.xlu1 %v1092_v47  ;;  %1057 = vmax.xlane.f32.xlu0 %v1056_v48  ;;  %v1074_v37 = vsel %vm1033_vm3, %v1073_v49, -1e+30  ;;  %v1146_v53 = vsel %vm1033_vm3, %v1145_v51, -1e+30  ;;  %v1128_v45 = vsel %vm1033_vm3, %v1127_v32, -1e+30  ;;  %v1199_v56 = vadd.f32 %v1054_v41, %v744_v2 }
 0x213   :  { %v1182_v55 = vsel %vm1033_vm3, %v1181_v0, -1e+30  ;;  %v1164_v52 = vsel %vm1033_vm3, %v1163_v54, -1e+30  ;;  %v1799_v57 = vsel %vm1033_vm3, %v1217_v46, -1e+30  ;;  %v1253_v58 = vadd.f32 %v1054_v41, %v817_v16 }
 0x214   :  { %v1200_v59 = vsel %vm1033_vm3, %v1199_v56, -1e+30  ;;  %v1235_v60 = vadd.f32 %v1054_v41, %v815_v11  ;;  %v1289_v63 = vadd.f32 %v1054_v41, %v888_v24  ;;  %v1271_v1 = vadd.f32 %v1054_v41, %v886_v20 }
 0x215   :  { %v1806_v61 = vsel %vm1033_vm3, %v1253_v58, -1e+30  ;;  %v1325_v4 = vadd.f32 %v1054_v41, %v959_v44  ;;  %v1307_v5 = vadd.f32 %v1054_v41, %v957_v28 }
 0x216   :  { %1111 = vmax.xlane.f32.xlu1 %v1110_v50  ;;  %1075 = vmax.xlane.f32.xlu0 %v1074_v37  ;;  %v1236_v62 = vsel %vm1033_vm3, %v1235_v60, -1e+30  ;;  %v1813_v2 = vsel %vm1033_vm3, %v1289_v63, -1e+30  ;;  %v1817_v3 = vsel %vm1033_vm3, %v1271_v1, -1e+30 }
 0x217   :  { %v1823_v6 = vsel %vm1033_vm3, %v1325_v4, -1e+30  ;;  %v1827_v7 = vsel %vm1033_vm3, %v1307_v5, -1e+30 }
 0x21a   :  { %1147 = vmax.xlane.f32.xlu1 %v1146_v53  ;;  %1129 = vmax.xlane.f32.xlu0 %v1128_v45 }
 0x21e   :  { %1183 = vmax.xlane.f32.xlu1 %v1182_v55  ;;  %1165 = vmax.xlane.f32.xlu0 %v1164_v52 }
 0x222   :  { %1219 = vmax.xlane.f32.xlu1 %v1799_v57  ;;  %1201 = vmax.xlane.f32.xlu0 %v1200_v59 }
 0x226   :  { %1255 = vmax.xlane.f32.xlu1 %v1806_v61  ;;  %1237 = vmax.xlane.f32.xlu0 %v1236_v62 }
 0x22a   :  { %1291 = vmax.xlane.f32.xlu1 %v1813_v2  ;;  %1273 = vmax.xlane.f32.xlu0 %v1817_v3 }
 0x22e   :  { %1327 = vmax.xlane.f32.xlu1 %v1823_v6  ;;  %1309 = vmax.xlane.f32.xlu0 %v1827_v7 }
 0x29b   :  { %v1094_v8 = vpop.xlane.xlu1 %1093  ;;  %v1058_v9 = vpop.xlane.xlu0 %1057 }
 0x29c   :  { %v1095_v10 = vsub.f32 %v1092_v47, %v1094_v8  ;;  %v1059_v11 = vsub.f32 %v1056_v48, %v1058_v9 }
 0x29e   :  { %v1060_v12 = vmul.f32 1.442695, %v1059_v11  ;;  %v1096_v15 = vmul.f32 1.442695, %v1095_v10  ;;  %v1034_v10 = vcvt.s32.f32 %v1772_v34 }
 0x29f   :  { %v1112_v13 = vpop.xlane.xlu1 %1111  ;;  %v1076_v14 = vpop.xlane.xlu0 %1075 }
 0x2a0   :  { %v1113_v16 = vsub.f32 %v1110_v50, %v1112_v13  ;;  %v1077_v17 = vsub.f32 %v1074_v37, %v1076_v14  ;;  %1442 = vpow2.f32 %v1060_v12  ;;  %v1035_v13 = vmul.f32 0.4, %v1034_v10 }
 0x2a1   :  { %1444 = vpow2.f32 %v1096_v15 }
 0x2a2   :  { %v1078_v18 = vmul.f32 1.442695, %v1077_v17  ;;  %v1114_v21 = vmul.f32 1.442695, %v1113_v16  ;;  %v1036_v16 = vadd.f32 -10.0, %v1035_v13 }
 0x2a3   :  { %v1148_v19 = vpop.xlane.xlu1 %1147  ;;  %v1130_v20 = vpop.xlane.xlu0 %1129 }
 0x2a4   :  { %v1149_v23 = vsub.f32 %v1146_v53, %v1148_v19  ;;  %v1131_v24 = vsub.f32 %v1128_v45, %v1130_v20  ;;  %1446 = vpow2.f32 %v1078_v18 }
 0x2a5   :  { %1448 = vpow2.f32 %v1114_v21  ;;  %v1889_v21 = vsel %vm1033_vm3, %v1036_v16, 0.0 }
 0x2a6   :  { %v1132_v25 = vmul.f32 1.442695, %v1131_v24  ;;  %v1150_v28 = vmul.f32 1.442695, %v1149_v23 }
 0x2a7   :  { %v1184_v26 = vpop.xlane.xlu1 %1183  ;;  %v1166_v27 = vpop.xlane.xlu0 %1165 }
 0x2a8   :  { %v1185_v29 = vsub.f32 %v1182_v55, %v1184_v26  ;;  %v1167_v30 = vsub.f32 %v1164_v52, %v1166_v27  ;;  %1450 = vpow2.f32 %v1132_v25 }
 0x2a9   :  { %1452 = vpow2.f32 %v1150_v28 }
 0x2aa   :  { %v1168_v31 = vmul.f32 1.442695, %v1167_v30  ;;  %v1186_v35 = vmul.f32 1.442695, %v1185_v29 }
 0x2ab   :  { %v1220_v44 = vpop.xlane.xlu1 %1219  ;;  %v1202_v33 = vpop.xlane.xlu0 %1201 }
 0x2ac   :  { %v1221_v36 = vsub.f32 %v1799_v57, %v1220_v44  ;;  %v1203_v38 = vsub.f32 %v1200_v59, %v1202_v33  ;;  %1454 = vpow2.f32 %v1168_v31 }
 0x2ad   :  { %v1832_v39 = vpop.eup %1442  ;;  %1456 = vpow2.f32 %v1186_v35 }
 0x2ae   :  { %v1204_v40 = vmul.f32 1.442695, %v1203_v38  ;;  %1062 = vadd.xlane.f32.xlu0 %v1832_v39  ;;  %v1222_v43 = vmul.f32 1.442695, %v1221_v36  ;;  %v1836_v22 = vpop.eup %1444 }
 0x2af   :  { %v1256_v41 = vpop.xlane.xlu1 %1255  ;;  %v1238_v42 = vpop.xlane.xlu0 %1237 }
 0x2b0   :  { %v1257_v47 = vsub.f32 %v1806_v61, %v1256_v41  ;;  %v1239_v48 = vsub.f32 %v1236_v62, %v1238_v42  ;;  %1458 = vpow2.f32 %v1204_v40 }
 0x2b1   :  { %v1838_v49 = vpop.eup %1446  ;;  %1460 = vpow2.f32 %v1222_v43 }
 0x2b2   :  { %v1240_v50 = vmul.f32 1.442695, %v1239_v48  ;;  %1098 = vadd.xlane.f32.xlu0 %v1836_v22  ;;  %1080 = vadd.xlane.f32.xlu1 %v1838_v49  ;;  %v1258_v32 = vmul.f32 1.442695, %v1257_v47  ;;  %v1844_v0 = vpop.eup %1448 }
 0x2b3   :  { %v1292_v37 = vpop.xlane.xlu1 %1291  ;;  %v1274_v51 = vpop.xlane.xlu0 %1273 }
 0x2b4   :  { %v1293_v53 = vsub.f32 %v1813_v2, %v1292_v37  ;;  %v1275_v45 = vsub.f32 %v1817_v3, %v1274_v51  ;;  %1462 = vpow2.f32 %v1240_v50 }
 0x2b5   :  { %v1846_v54 = vpop.eup %1450  ;;  %1464 = vpow2.f32 %v1258_v32 }
 0x2b6   :  { %v1276_v55 = vmul.f32 1.442695, %v1275_v45  ;;  %1116 = vadd.xlane.f32.xlu1 %v1844_v0  ;;  %1134 = vadd.xlane.f32.xlu0 %v1846_v54  ;;  %v1294_v56 = vmul.f32 1.442695, %v1293_v53  ;;  %v1851_v59 = vpop.eup %1452 }
 0x2b7   :  { %v1328_v52 = vpop.xlane.xlu1 %1327  ;;  %v1310_v46 = vpop.xlane.xlu0 %1309 }
 0x2b8   :  { %v1311_v57 = vsub.f32 %v1827_v7, %v1310_v46  ;;  %1466 = vpow2.f32 %v1276_v55  ;;  %v1329_v58 = vsub.f32 %v1823_v6, %v1328_v52 }
 0x2b9   :  { %v1854_v60 = vpop.eup %1454  ;;  %1468 = vpow2.f32 %v1294_v56 }
 0x2ba   :  { %v1312_v61 = vmul.f32 1.442695, %v1311_v57  ;;  %1152 = vadd.xlane.f32.xlu1 %v1851_v59  ;;  %1170 = vadd.xlane.f32.xlu0 %v1854_v60  ;;  %v1858_v62 = vpop.eup %1456  ;;  %v1330_v63 = vmul.f32 1.442695, %v1329_v58 }
 0x2bc   :  { %1470 = vpow2.f32 %v1312_v61 }
 0x2bd   :  { %v1860_v1 = vpop.eup %1458  ;;  %1472 = vpow2.f32 %v1330_v63 }
 0x2be   :  { %1188 = vadd.xlane.f32.xlu1 %v1858_v62  ;;  %1206 = vadd.xlane.f32.xlu0 %v1860_v1  ;;  %v1864_v2 = vpop.eup %1460 }
 0x2c1   :  { %v1866_v3 = vpop.eup %1462 }
 0x2c2   :  { %1224 = vadd.xlane.f32.xlu1 %v1864_v2  ;;  %1242 = vadd.xlane.f32.xlu0 %v1866_v3  ;;  %v1870_v4 = vpop.eup %1464 }
 0x2c5   :  { %v1872_v5 = vpop.eup %1466 }
 0x2c6   :  { %1260 = vadd.xlane.f32.xlu1 %v1870_v4  ;;  %1278 = vadd.xlane.f32.xlu0 %v1872_v5  ;;  %v1876_v6 = vpop.eup %1468 }
 0x2c9   :  { %v1878_v7 = vpop.eup %1470 }
 0x2ca   :  { %1296 = vadd.xlane.f32.xlu1 %v1876_v6  ;;  %1314 = vadd.xlane.f32.xlu0 %v1878_v7  ;;  %v1882_v8 = vpop.eup %1472 }
 0x2ce   :  { %1332 = vadd.xlane.f32.xlu1 %v1882_v8 }
 0x337   :  { %v1063_v9 = vpop.xlane.xlu0 %1062 }
 0x338   :  { %1474 = vrcp.f32 %v1063_v9 }
 0x33b   :  { %v1081_v11 = vpop.xlane.xlu1 %1080  ;;  %v1099_v12 = vpop.xlane.xlu0 %1098 }
 0x33c   :  { %1476 = vrcp.f32 %v1081_v11 }
 0x33d   :  { %1478 = vrcp.f32 %v1099_v12 }
 0x33f   :  { %v1117_v14 = vpop.xlane.xlu1 %1116  ;;  %v1135_v15 = vpop.xlane.xlu0 %1134 }
 0x340   :  { %1480 = vrcp.f32 %v1117_v14 }
 0x341   :  { %1482 = vrcp.f32 %v1135_v15 }
 0x343   :  { %v1153_v17 = vpop.xlane.xlu1 %1152  ;;  %v1171_v18 = vpop.xlane.xlu0 %1170 }
 0x344   :  { %1484 = vrcp.f32 %v1153_v17 }
 0x345   :  { %v1475_v19 = vpop.eup %1474  ;;  %1486 = vrcp.f32 %v1171_v18 }
 0x346   :  { %v1065_v20 = vmul.f32 %v1475_v19, %v1832_v39 }
 0x347   :  { %v1189_v23 = vpop.xlane.xlu1 %1188  ;;  %v1207_v24 = vpop.xlane.xlu0 %1206 }
 0x348   :  { %1488 = vrcp.f32 %v1189_v23  ;;  %v1066_v25 = vadd.f32 1e-06, %v1065_v20 }
 0x349   :  { %v1477_v26 = vpop.eup %1476  ;;  %1490 = vrcp.f32 %v1207_v24 }
 0x34a   :  { %v1479_v27 = vpop.eup %1478  ;;  %v1068_v28 = vmul.f32 %v1066_v25, %v1889_v21  ;;  %1067 = vst [vmem:[#allocation11] sm:$0xff] %v1066_v25  ;;  %v1083_v29 = vmul.f32 %v1477_v26, %v1838_v49 }
 0x34b   :  { %v1225_v30 = vpop.xlane.xlu1 %1224  ;;  %v1243_v31 = vpop.xlane.xlu0 %1242  ;;  %v1101_v44 = vmul.f32 %v1479_v27, %v1836_v22 }
 0x34c   :  { %1492 = vrcp.f32 %v1225_v30  ;;  %1069 = vadd.xlane.f32.xlu0 %v1068_v28  ;;  %v1084_v34 = vadd.f32 1e-06, %v1083_v29 }
 0x34d   :  { %v1481_v33 = vpop.eup %1480  ;;  %1494 = vrcp.f32 %v1243_v31  ;;  %v1102_v35 = vadd.f32 1e-06, %v1101_v44 }
 0x34e   :  { %v1483_v36 = vpop.eup %1482  ;;  %v1086_v38 = vmul.f32 %v1084_v34, %v1889_v21  ;;  %1085 = vst [vmem:[#allocation11 + $0x8] sm:$0xff] %v1084_v34  ;;  %v1119_v39 = vmul.f32 %v1481_v33, %v1844_v0 }
 0x34f   :  { %v1261_v40 = vpop.xlane.xlu1 %1260  ;;  %v1279_v41 = vpop.xlane.xlu0 %1278  ;;  %v1104_v42 = vmul.f32 %v1102_v35, %v1889_v21  ;;  %1103 = vst [vmem:[#allocation11 + $0x10] sm:$0xff] %v1102_v35  ;;  %v1137_v43 = vmul.f32 %v1483_v36, %v1846_v54 }
 0x350   :  { %1496 = vrcp.f32 %v1261_v40  ;;  %1087 = vadd.xlane.f32.xlu1 %v1086_v38  ;;  %v1120_v47 = vadd.f32 1e-06, %v1119_v39 }
 0x351   :  { %v1485_v48 = vpop.eup %1484  ;;  %1498 = vrcp.f32 %v1279_v41  ;;  %1105 = vadd.xlane.f32.xlu0 %v1104_v42  ;;  %v1138_v22 = vadd.f32 1e-06, %v1137_v43 }
 0x352   :  { %v1487_v49 = vpop.eup %1486  ;;  %v1122_v50 = vmul.f32 %v1120_v47, %v1889_v21  ;;  %1121 = vst [vmem:[#allocation11 + $0x18] sm:$0xff] %v1120_v47  ;;  %v1155_v37 = vmul.f32 %v1485_v48, %v1851_v59 }
 0x353   :  { %v1297_v51 = vpop.xlane.xlu1 %1296  ;;  %v1315_v32 = vpop.xlane.xlu0 %1314  ;;  %v1140_v53 = vmul.f32 %v1138_v22, %v1889_v21  ;;  %1139 = vst [vmem:[#allocation11 + $0x20] sm:$0xff] %v1138_v22  ;;  %v1173_v45 = vmul.f32 %v1487_v49, %v1854_v60 }
 0x354   :  { %1500 = vrcp.f32 %v1297_v51  ;;  %1123 = vadd.xlane.f32.xlu1 %v1122_v50  ;;  %v1156_v0 = vadd.f32 1e-06, %v1155_v37 }
 0x355   :  { %v1489_v54 = vpop.eup %1488  ;;  %1502 = vrcp.f32 %v1315_v32  ;;  %1141 = vadd.xlane.f32.xlu0 %v1140_v53  ;;  %v1174_v55 = vadd.f32 1e-06, %v1173_v45 }
 0x356   :  { %v1491_v52 = vpop.eup %1490  ;;  %v1158_v46 = vmul.f32 %v1156_v0, %v1889_v21  ;;  %1157 = vst [vmem:[#allocation11 + $0x28] sm:$0xff] %v1156_v0  ;;  %v1191_v56 = vmul.f32 %v1489_v54, %v1858_v62 }
 0x357   :  { %v1333_v57 = vpop.xlane.xlu1 %1332  ;;  %v1176_v59 = vmul.f32 %v1174_v55, %v1889_v21  ;;  %1175 = vst [vmem:[#allocation11 + $0x30] sm:$0xff] %v1174_v55  ;;  %v1209_v58 = vmul.f32 %v1491_v52, %v1860_v1 }
 0x358   :  { %1504 = vrcp.f32 %v1333_v57  ;;  %1159 = vadd.xlane.f32.xlu1 %v1158_v46  ;;  %v1192_v60 = vadd.f32 1e-06, %v1191_v56 }
 0x359   :  { %v1493_v61 = vpop.eup %1492  ;;  %1177 = vadd.xlane.f32.xlu0 %v1176_v59  ;;  %v1210_v63 = vadd.f32 1e-06, %v1209_v58 }
 0x35a   :  { %v1495_v9 = vpop.eup %1494  ;;  %v1194_v10 = vmul.f32 %v1192_v60, %v1889_v21  ;;  %1193 = vst [vmem:[#allocation11 + $0x38] sm:$0xff] %v1192_v60  ;;  %v1227_v11 = vmul.f32 %v1493_v61, %v1864_v2 }
 0x35b   :  { %v1212_v62 = vmul.f32 %v1210_v63, %v1889_v21  ;;  %1211 = vst [vmem:[#allocation11 + $0x40] sm:$0xff] %v1210_v63  ;;  %v1245_v12 = vmul.f32 %v1495_v9, %v1866_v3 }
 0x35c   :  { %1195 = vadd.xlane.f32.xlu1 %v1194_v10  ;;  %v1228_v13 = vadd.f32 1e-06, %v1227_v11 }
 0x35d   :  { %v1497_v1 = vpop.eup %1496  ;;  %1213 = vadd.xlane.f32.xlu0 %v1212_v62  ;;  %v1246_v14 = vadd.f32 1e-06, %v1245_v12 }
 0x35e   :  { %v1499_v15 = vpop.eup %1498  ;;  %v1230_v16 = vmul.f32 %v1228_v13, %v1889_v21  ;;  %1229 = vst [vmem:[#allocation11 + $0x48] sm:$0xff] %v1228_v13  ;;  %v1263_v17 = vmul.f32 %v1497_v1, %v1870_v4 }
 0x35f   :  { %v1248_v18 = vmul.f32 %v1246_v14, %v1889_v21  ;;  %1247 = vst [vmem:[#allocation11 + $0x50] sm:$0xff] %v1246_v14  ;;  %v1281_v2 = vmul.f32 %v1499_v15, %v1872_v5 }
 0x360   :  { %1231 = vadd.xlane.f32.xlu1 %v1230_v16  ;;  %v1264_v19 = vadd.f32 1e-06, %v1263_v17 }
 0x361   :  { %v1501_v20 = vpop.eup %1500  ;;  %1249 = vadd.xlane.f32.xlu0 %v1248_v18  ;;  %v1282_v3 = vadd.f32 1e-06, %v1281_v2 }
 0x362   :  { %v1503_v23 = vpop.eup %1502  ;;  %v1266_v24 = vmul.f32 %v1264_v19, %v1889_v21  ;;  %1265 = vst [vmem:[#allocation11 + $0x58] sm:$0xff] %v1264_v19  ;;  %v1299_v25 = vmul.f32 %v1501_v20, %v1876_v6 }
 0x363   :  { %v1284_v26 = vmul.f32 %v1282_v3, %v1889_v21  ;;  %1283 = vst [vmem:[#allocation11 + $0x60] sm:$0xff] %v1282_v3  ;;  %v1317_v4 = vmul.f32 %v1503_v23, %v1878_v7 }
 0x364   :  { %1267 = vadd.xlane.f32.xlu1 %v1266_v24  ;;  %v1300_v27 = vadd.f32 1e-06, %v1299_v25 }
 0x365   :  { %v1505_v28 = vpop.eup %1504  ;;  %1285 = vadd.xlane.f32.xlu0 %v1284_v26  ;;  %v1318_v5 = vadd.f32 1e-06, %v1317_v4 }
 0x366   :  { %v1302_v29 = vmul.f32 %v1300_v27, %v1889_v21  ;;  %1301 = vst [vmem:[#allocation11 + $0x68] sm:$0xff] %v1300_v27  ;;  %v1335_v30 = vmul.f32 %v1505_v28, %v1882_v8 }
 0x367   :  { %v1320_v31 = vmul.f32 %v1318_v5, %v1889_v21  ;;  %1319 = vst [vmem:[#allocation11 + $0x70] sm:$0xff] %v1318_v5 }
 0x368   :  { %1303 = vadd.xlane.f32.xlu1 %v1302_v29  ;;  %v1336_v6 = vadd.f32 1e-06, %v1335_v30 }
 0x369   :  { %1321 = vadd.xlane.f32.xlu0 %v1320_v31 }
 0x36a   :  { %v1338_v44 = vmul.f32 %v1336_v6, %v1889_v21  ;;  %1337 = vst [vmem:[#allocation11 + $0x78] sm:$0xff] %v1336_v6 }
 0x36c   :  { %1339 = vadd.xlane.f32.xlu1 %v1338_v44 }
 0x36d   :  { %1597 = shalt.err (!%p1594_p10)
}
 0x36e   :  { %1362 = dma.vmem_to_hbm [thread:$0]  %s1360_s20, 2048, %s1934_s6, [#allocation12]   ;;  %vm1071_vm4 = vcmask 7168   ;;  %vm1089_vm5 = vcmask 15368   ;;  %vm1107_vm6 = vcmask 23568   ;;  %vm1125_vm7 = vcmask 31768  }
 0x36f   :  { %vm1143_vm8 = vcmask 39968   ;;  %vm1161_vm9 = vcmask 48168   ;;  %vm1179_vm10 = vcmask 56368   ;;  %vm1197_vm11 = vcmask 64568   ;;  %s1647_s6 = smov [#allocation10]  }
 0x370   :  { %vm1215_vm12 = vcmask 72768   ;;  %vm1233_vm13 = vcmask 80968   ;;  %vm1251_vm14 = vcmask 89168   ;;  %vm1269_vm15 = vcmask 97368   ;;  %s1349_s24 = sshll.u32 %s1647_s6, 4  ;;  %s1350_s24 = int_to_ptr.vmem [resolvable:$true] %s1349_s24 }
 0x371   :  { %vm1287_vm0 = vcmask 105568   ;;  %vm1305_vm1 = vcmask 113768   ;;  %vm1323_vm2 = vcmask 121968   ;;  %vm1341_vm3 = vcmask 130168   ;;  %s1606_s25 = scalar_lea.vmem %s1350_s24, 128  ;;  %p1611_p12 = scmp.lt.s32.totalorder %s1350_s24, %s1350_s24 }
 0x372   :  { %p1607_p11 = scmp.ne.s32.totalorder %s1350_s24, %s1606_s25  ;;  %p1612_p13 = scmp.lt.s32.totalorder %s1606_s25, %s1606_s25 }
 0x374   :  { %p1613_p0 = por %p1612_p13, %p1611_p12 }
 0x376   :  { %p1614_p1 = pnand %p1613_p0, %p1607_p11 }
 0x3d5   :  { %v1070_v7 = vpop.xlane.xlu0 %1069 }
 0x3d6   :  { %1072 = vst.msk [vmem:[#allocation10] sm:$0xff] %vm1071_vm4, %v1070_v7 }
 0x3d9   :  { %v1088_v8 = vpop.xlane.xlu1 %1087 }
 0x3da   :  { %1090 = vst.msk [vmem:[#allocation10] sm:$0xff] %vm1089_vm5, %v1088_v8  ;;  %v1106_v21 = vpop.xlane.xlu0 %1105 }
 0x3db   :  { %1108 = vst.msk [vmem:[#allocation10] sm:$0xff] %vm1107_vm6, %v1106_v21 }
 0x3dd   :  { %v1124_v34 = vpop.xlane.xlu1 %1123 }
 0x3de   :  { %1126 = vst.msk [vmem:[#allocation10] sm:$0xff] %vm1125_vm7, %v1124_v34  ;;  %v1142_v33 = vpop.xlane.xlu0 %1141 }
 0x3df   :  { %1144 = vst.msk [vmem:[#allocation10] sm:$0xff] %vm1143_vm8, %v1142_v33 }
 0x3e1   :  { %v1160_v35 = vpop.xlane.xlu1 %1159 }
 0x3e2   :  { %1162 = vst.msk [vmem:[#allocation10] sm:$0xff] %vm1161_vm9, %v1160_v35  ;;  %v1178_v36 = vpop.xlane.xlu0 %1177 }
 0x3e3   :  { %1180 = vst.msk [vmem:[#allocation10] sm:$0xff] %vm1179_vm10, %v1178_v36 }
 0x3e5   :  { %v1196_v38 = vpop.xlane.xlu1 %1195 }
 0x3e6   :  { %1198 = vst.msk [vmem:[#allocation10] sm:$0xff] %vm1197_vm11, %v1196_v38  ;;  %v1214_v39 = vpop.xlane.xlu0 %1213 }
 0x3e7   :  { %1216 = vst.msk [vmem:[#allocation10] sm:$0xff] %vm1215_vm12, %v1214_v39 }
 0x3e9   :  { %v1232_v40 = vpop.xlane.xlu1 %1231 }
 0x3ea   :  { %1234 = vst.msk [vmem:[#allocation10] sm:$0xff] %vm1233_vm13, %v1232_v40  ;;  %v1250_v41 = vpop.xlane.xlu0 %1249 }
 0x3eb   :  { %1252 = vst.msk [vmem:[#allocation10] sm:$0xff] %vm1251_vm14, %v1250_v41 }
 0x3ed   :  { %v1268_v42 = vpop.xlane.xlu1 %1267 }
 0x3ee   :  { %1270 = vst.msk [vmem:[#allocation10] sm:$0xff] %vm1269_vm15, %v1268_v42  ;;  %v1286_v43 = vpop.xlane.xlu0 %1285 }
 0x3ef   :  { %1288 = vst.msk [vmem:[#allocation10] sm:$0xff] %vm1287_vm0, %v1286_v43 }
 0x3f1   :  { %v1304_v47 = vpop.xlane.xlu1 %1303 }
 0x3f2   :  { %1306 = vst.msk [vmem:[#allocation10] sm:$0xff] %vm1305_vm1, %v1304_v47  ;;  %v1322_v48 = vpop.xlane.xlu0 %1321 }
 0x3f3   :  { %1324 = vst.msk [vmem:[#allocation10] sm:$0xff] %vm1323_vm2, %v1322_v48 }
 0x3f5   :  { %v1340_v22 = vpop.xlane.xlu1 %1339 }
 0x3f6   :  { %1342 = vst.msk [vmem:[#allocation10] sm:$0xff] %vm1341_vm3, %v1340_v22 }
 0x3f7   :  { %1617 = shalt.err (!%p1614_p1)
}
 0x3f8   :  { %1352 = dma.vmem_to_hbm [thread:$0]  %s1350_s24, 128, %s1933_s5, [#allocation4]  }
 0x3f9   :  { %1632 = dma.done.wait [#allocation4], 128  }
 0x3fa   :  { %1633 = vsyncadd [#allocation4], 4294967168 }
 0x3fb   :  { %1634 = dma.done.wait [#allocation12], 2048  }
 0x3fc   :  { %1635 = vsyncadd [#allocation12], 4294965248 }
 0x3fd   :  { %1369 = vsyncpa [#allocation3], 1 }
 0x3fe   :  { %1370 = vsyncpa [#allocation6], 1 }
 0x3ff   :  { %1371 = vsyncpa [#allocation9], 1 }
 0x400   :  { %1372 = vsyncpa [#allocation4], 1 }
 0x401   :  { %1373 = vsyncpa [#allocation12], 1 }

</bundles_post_ra>
